<compile_context>
chip_gen: v5e
topology: v5e:2x2
jax: 0.10.0
libtpu: 0.0.40
codegen_flags: <defaults>
</compile_context>

<pallas_src>
import math

import jax
import jax.numpy as jnp
from jax import lax
from jax.experimental import pallas as pl
from jax.experimental.pallas import tpu as pltpu

EPS = 1e-5  # PyTorch LayerNorm default


# ---------------------------------------------------------------- in-kernel helpers

def _erf(x):
    # Abramowitz & Stegun 7.1.26 (max abs err ~1.5e-7): exact-erf GELU at f32 precision,
    # built only from exp/mul/add so it is guaranteed to lower in Mosaic.
    a1, a2, a3, a4, a5 = 0.254829592, -0.284496736, 1.421413741, -1.453152027, 1.061405429
    p = 0.3275911
    ax = jnp.abs(x)
    t = 1.0 / (1.0 + p * ax)
    poly = ((((a5 * t + a4) * t + a3) * t + a2) * t + a1) * t
    y = 1.0 - poly * jnp.exp(-ax * ax)
    return jnp.where(x >= 0, y, -y)


def _gelu_exact(x):
    return 0.5 * x * (1.0 + _erf(x * (1.0 / math.sqrt(2.0))))


# ---------------------------------------------------------------------------- kernel

def make_attention_layer_kernel(num_heads, embed_dim, hidden_dim):
    E = embed_dim
    H = num_heads
    hd = E // num_heads

    # batched-matmul dimension numbers (group axis 0 is the batch axis everywhere)
    DN_PROJ = (((2,), (1,)), ((0,), (0,)))   # 'gle,ged->gld'
    DN_QK   = (((2,), (2,)), ((0,), (0,)))   # 'hqd,hkd->hqk'
    DN_PV   = (((2,), (1,)), ((0,), (0,)))   # 'hqk,hkd->hqd'  (also 'hqd,hde->hqe')

    def kernel(q_ref, a_ref, wqkv_ref, bqkv_ref, wo_ref, w1_ref, w2_ref, vec_ref, out_ref):
        x = q_ref[0]          # (Lq, E)
        audio = a_ref[0]      # (La, E)
        vec = vec_ref[...]    # (10, Vpad) coalesced biases / LN params

        def vrow(i, n):       # (1, n) slice of the parameter slab (lane offset 0 -> aligned)
            return vec[i:i + 1, :n]

        def layer_norm(y, g, b):
            mu = jnp.mean(y, axis=-1, keepdims=True)
            var = jnp.mean((y - mu) ** 2, axis=-1, keepdims=True)
            return (y - mu) * lax.rsqrt(var + EPS) * g + b

        def project(x_in, w, b, groups):
            # x_in: (L, E), w: (groups, E, hd), b: (groups, 1, hd) -> (groups, L, hd)
            xb = jnp.broadcast_to(x_in, (groups, x_in.shape[0], E))
            return lax.dot_general(xb, w, DN_PROJ,
                                   preferred_element_type=jnp.float32) + b

        def attend(qh, kh, vh, o_idx, bo):
            # qh: (H, Lq, hd), kh/vh: (H, Lk, hd).  Q already carries the 1/sqrt(hd) scale.
            s = lax.dot_general(qh, kh, DN_QK,
                                preferred_element_type=jnp.float32)       # (H, Lq, Lk)
            m = jnp.max(s, axis=-1, keepdims=True)                        # per-head row max
            e = jnp.exp(s - m)
            # exact division keeps the 1e-4 match; pl.reciprocal(approx=True) is the
            # EUP-cheap alternative if tolerance allows.
            p = e / jnp.sum(e, axis=-1, keepdims=True)
            o = lax.dot_general(p, vh, DN_PV,
                                preferred_element_type=jnp.float32)       # (H, Lq, hd)
            # fused head-concat + out-projection: 'hqd,hde->hqe', then sum over heads
            oh = lax.dot_general(o, wo_ref[o_idx], DN_PV,
                                 preferred_element_type=jnp.float32)      # (H, Lq, E)
            return jnp.sum(oh, axis=0) + bo                               # (Lq, E)

        # ---- self-attention: Q/K/V in ONE batched matmul over 3H head-groups
        qkv = project(x, wqkv_ref[0:3 * H], bqkv_ref[0:3 * H], 3 * H)     # (3H, Lq, hd)
        sa = attend(qkv[0:H], qkv[H:2 * H], qkv[2 * H:3 * H], 0, vrow(0, E))
        x = layer_norm(x + sa, vrow(4, E), vrow(5, E))

        # ---- cross-attention: Q from x, K/V in ONE batched matmul over 2H head-groups
        qh = project(x, wqkv_ref[3 * H:4 * H], bqkv_ref[3 * H:4 * H], H)  # (H, Lq, hd)
        kv = project(audio, wqkv_ref[4 * H:6 * H], bqkv_ref[4 * H:6 * H], 2 * H)
        ca = attend(qh, kv[0:H], kv[H:2 * H], 1, vrow(1, E))
        x = layer_norm(x + ca, vrow(6, E), vrow(7, E))

        # ---- FFN (Linear -> GELU -> Linear) + residual + norm3
        h = jnp.dot(x, w1_ref[...], preferred_element_type=jnp.float32) + vrow(2, hidden_dim)
        h = _gelu_exact(h)
        y = jnp.dot(h, w2_ref[...], preferred_element_type=jnp.float32) + vrow(3, E)
        x = layer_norm(x + y, vrow(8, E), vrow(9, E))

        out_ref[0] = x

    return kernel


# --------------------------------------------------------------------------- wrapper

def attention_layer_forward(query, audio_feat, params, num_heads):
    B, Lq, E = query.shape
    _, La, _ = audio_feat.shape
    hidden = params["ffn_w1"].shape[0]
    hd = E // num_heads
    scale = 1.0 / math.sqrt(hd)

    # -------- wrapper-side weight packing (free XLA reshapes, done once) --------
    def in_proj_heads(in_w, in_b):
        # in_w: (3E, E) fused PyTorch in_proj -> per-head (H, E, hd) weights, (H,1,hd) biases
        ws, bs = [], []
        for i in range(3):
            w = in_w[i * E:(i + 1) * E]                                   # (E_out, E_in)
            b = in_b[i * E:(i + 1) * E]
            ws.append(w.T.reshape(E, num_heads, hd).transpose(1, 0, 2))   # (H, E, hd)
            bs.append(b.reshape(num_heads, 1, hd))                        # (H, 1, hd)
        return ws, bs

    sa_ws, sa_bs = in_proj_heads(params["sa_in_w"], params["sa_in_b"])
    ca_ws, ca_bs = in_proj_heads(params["ca_in_w"], params["ca_in_b"])
    # fold the attention scale into the Q projection (saves a VPU multiply per step)
    sa_ws[0], sa_bs[0] = sa_ws[0] * scale, sa_bs[0] * scale
    ca_ws[0], ca_bs[0] = ca_ws[0] * scale, ca_bs[0] * scale

    # stacked [sa_q | sa_k | sa_v | ca_q | ca_k | ca_v], each block H heads wide
    w_qkv_h = jnp.concatenate(sa_ws + ca_ws, axis=0)    # (6H, E, hd)
    b_qkv_h = jnp.concatenate(sa_bs + ca_bs, axis=0)    # (6H, 1, hd)

    # out-projection weights, head-split so the kernel fuses concat + projection
    w_o_h = jnp.stack([params["sa_out_w"].T.reshape(num_heads, hd, E),
                       params["ca_out_w"].T.reshape(num_heads, hd, E)])   # (2, H, hd, E)

    w1_t = params["ffn_w1"].T                     # (E, hidden)
    w2_t = params["ffn_w2"].T                     # (hidden, E)

    # coalesce all remaining small vectors into one slab (lane offset 0 for every row)
    vpad = max(E, hidden)
    def row(v):
        return jnp.pad(v.astype(jnp.float32), (0, vpad - v.shape[0]))
    vec = jnp.stack([
        row(params["sa_out_b"]), row(params["ca_out_b"]),
        row(params["ffn_b1"]), row(params["ffn_b2"]),
        row(params["n1_w"]), row(params["n1_b"]),
        row(params["n2_w"]), row(params["n2_b"]),
        row(params["n3_w"]), row(params["n3_b"]),
    ])                                            # (10, vpad)

    def const_spec(shape):
        return pl.BlockSpec(shape, lambda b, _n=len(shape): (0,) * _n)

    in_specs = [
        pl.BlockSpec((1, Lq, E), lambda b: (b, 0, 0)),   # query
        pl.BlockSpec((1, La, E), lambda b: (b, 0, 0)),   # audio_feat
        const_spec(w_qkv_h.shape),
        const_spec(b_qkv_h.shape),
        const_spec(w_o_h.shape),
        const_spec(w1_t.shape),
        const_spec(w2_t.shape),
        const_spec(vec.shape),
    ]

    return pl.pallas_call(
        make_attention_layer_kernel(num_heads, E, hidden),
        out_shape=jax.ShapeDtypeStruct((B, Lq, E), jnp.float32),
        grid=(B,),
        in_specs=in_specs,
        out_specs=pl.BlockSpec((1, Lq, E), lambda b: (b, 0, 0)),
        compiler_params=pltpu.CompilerParams(dimension_semantics=("parallel",)),
    )(query, audio_feat, w_qkv_h, b_qkv_h, w_o_h, w1_t, w2_t, vec)


# --------------------------------------------------------------- params & reference

def init_params(key, embed_dim, hidden_dim):
    E, H = embed_dim, hidden_dim
    ks = jax.random.split(key, 12)
    u = lambda k, shape, s=0.1: jax.random.uniform(k, shape, jnp.float32, -s, s)
    return dict(
        sa_in_w=u(ks[0], (3 * E, E)), sa_in_b=u(ks[1], (3 * E,)),
        sa_out_w=u(ks[2], (E, E)),    sa_out_b=u(ks[3], (E,)),
        ca_in_w=u(ks[4], (3 * E, E)), ca_in_b=u(ks[5], (3 * E,)),
        ca_out_w=u(ks[6], (E, E)),    ca_out_b=u(ks[7], (E,)),
        ffn_w1=u(ks[8], (H, E)),      ffn_b1=u(ks[9], (H,)),
        ffn_w2=u(ks[10], (E, H)),     ffn_b2=u(ks[11], (E,)),
        n1_w=jnp.ones((E,), jnp.float32), n1_b=jnp.zeros((E,), jnp.float32),
        n2_w=jnp.ones((E,), jnp.float32), n2_b=jnp.zeros((E,), jnp.float32),
        n3_w=jnp.ones((E,), jnp.float32), n3_b=jnp.zeros((E,), jnp.float32),
    )


def reference_forward(query, audio_feat, params, num_heads):
    """Pure-JAX reference mirroring PyTorch nn.MultiheadAttention / LayerNorm / GELU."""
    def mha(xq, xkv, in_w, in_b, out_w, out_b):
        B, Lq, E = xq.shape
        hd = E // num_heads
        q = xq @ in_w[:E].T + in_b[:E]
        k = xkv @ in_w[E:2 * E].T + in_b[E:2 * E]
        v = xkv @ in_w[2 * E:].T + in_b[2 * E:]
        sh = lambda t: t.reshape(t.shape[0], t.shape[1], num_heads, hd).transpose(0, 2, 1, 3)
        qh, kh, vh = sh(q), sh(k), sh(v)
        s = jnp.einsum("bhqd,bhkd->bhqk", qh, kh) / math.sqrt(hd)
        p = jax.nn.softmax(s, axis=-1)
        o = jnp.einsum("bhqk,bhkd->bhqd", p, vh).transpose(0, 2, 1, 3).reshape(B, Lq, E)
        return o @ out_w.T + out_b

    def ln(x, w, b):
        m = x.mean(-1, keepdims=True)
        v = ((x - m) ** 2).mean(-1, keepdims=True)
        return (x - m) / jnp.sqrt(v + EPS) * w + b

    x = query
    x = ln(x + mha(x, x, params["sa_in_w"], params["sa_in_b"],
                   params["sa_out_w"], params["sa_out_b"]), params["n1_w"], params["n1_b"])
    x = ln(x + mha(x, audio_feat, params["ca_in_w"], params["ca_in_b"],
                   params["ca_out_w"], params["ca_out_b"]), params["n2_w"], params["n2_b"])
    h = x @ params["ffn_w1"].T + params["ffn_b1"]
    h = 0.5 * h * (1.0 + lax.erf(h / math.sqrt(2.0)))   # exact (erf) GELU
    x = ln(x + h @ params["ffn_w2"].T + params["ffn_b2"], params["n3_w"], params["n3_b"])
    return x


# ------------------------------------------------------------------------------ main

if __name__ == "__main__":
    B, Lq, La, E, NUM_HEADS, HIDDEN = 2, 8, 6, 32, 4, 64

    key = jax.random.PRNGKey(0)
    kq, ka, kp = jax.random.split(key, 3)
    query = jax.random.normal(kq, (B, Lq, E), jnp.float32)
    audio_feat = jax.random.normal(ka, (B, La, E), jnp.float32)
    params = init_params(kp, E, HIDDEN)

    out = attention_layer_forward(query, audio_feat, params, NUM_HEADS)
    out = jax.block_until_ready(out)

    ref = reference_forward(query, audio_feat, params, NUM_HEADS)
    assert out.shape == (B, Lq, E)

    import numpy as np
    np.testing.assert_allclose(np.asarray(out), np.asarray(ref), atol=1e-4, rtol=1e-4)
    print("KERNEL_OK")
</pallas_src>

<mosaic_0001>
module attributes {stable_mosaic.version = 11 : i64} {
  func.func @kernel(%arg0: i32, %arg1: memref<1x8x32xf32, #tpu.memory_space<vmem>>, %arg2: memref<1x6x32xf32, #tpu.memory_space<vmem>>, %arg3: memref<24x32x8xf32, #tpu.memory_space<vmem>>, %arg4: memref<24x1x8xf32, #tpu.memory_space<vmem>>, %arg5: memref<2x4x8x32xf32, #tpu.memory_space<vmem>>, %arg6: memref<32x64xf32, #tpu.memory_space<vmem>>, %arg7: memref<64x32xf32, #tpu.memory_space<vmem>>, %arg8: memref<10x64xf32, #tpu.memory_space<vmem>>, %arg9: memref<1x8x32xf32, #tpu.memory_space<vmem>>) attributes {dimension_semantics = [#tpu.dimension_semantics<parallel>], iteration_bounds = array<i64: 2>, scalar_prefetch = 0 : i64, scratch_operands = 0 : i64, tpu.core_type = #tpu.core_type<tc>, window_params = [{transform_indices = @transform_0, window_bounds = array<i64: 1, 8, 32>}, {transform_indices = @transform_1, window_bounds = array<i64: 1, 6, 32>}, {pipeline_mode = #tpu.pipeline_mode<synchronous>, transform_indices = @transform_2, window_bounds = array<i64: 24, 32, 8>}, {pipeline_mode = #tpu.pipeline_mode<synchronous>, transform_indices = @transform_3, window_bounds = array<i64: 24, 1, 8>}, {pipeline_mode = #tpu.pipeline_mode<synchronous>, transform_indices = @transform_4, window_bounds = array<i64: 2, 4, 8, 32>}, {pipeline_mode = #tpu.pipeline_mode<synchronous>, transform_indices = @transform_5, window_bounds = array<i64: 32, 64>}, {pipeline_mode = #tpu.pipeline_mode<synchronous>, transform_indices = @transform_6, window_bounds = array<i64: 64, 32>}, {pipeline_mode = #tpu.pipeline_mode<synchronous>, transform_indices = @transform_7, window_bounds = array<i64: 10, 64>}, {transform_indices = @transform_8, window_bounds = array<i64: 1, 8, 32>}]} {
    %c0 = arith.constant 0 : index
    %c0_0 = arith.constant 0 : index
    %c0_1 = arith.constant 0 : index
    %0 = vector.load %arg1[%c0, %c0_0, %c0_1] : memref<1x8x32xf32, #tpu.memory_space<vmem>>, vector<1x8x32xf32>
    %1 = vector.shape_cast %0 : vector<1x8x32xf32> to vector<8x32xf32>
    %c0_2 = arith.constant 0 : index
    %c0_3 = arith.constant 0 : index
    %c0_4 = arith.constant 0 : index
    %2 = vector.load %arg2[%c0_2, %c0_3, %c0_4] : memref<1x6x32xf32, #tpu.memory_space<vmem>>, vector<1x6x32xf32>
    %3 = vector.shape_cast %2 : vector<1x6x32xf32> to vector<6x32xf32>
    %c0_5 = arith.constant 0 : index
    %c0_6 = arith.constant 0 : index
    %4 = vector.load %arg8[%c0_5, %c0_6] : memref<10x64xf32, #tpu.memory_space<vmem>>, vector<10x64xf32>
    %c0_7 = arith.constant 0 : index
    %c0_8 = arith.constant 0 : index
    %c0_9 = arith.constant 0 : index
    %5 = vector.load %arg3[%c0_7, %c0_8, %c0_9] : memref<24x32x8xf32, #tpu.memory_space<vmem>>, vector<12x32x8xf32>
    %c0_10 = arith.constant 0 : index
    %c0_11 = arith.constant 0 : index
    %c0_12 = arith.constant 0 : index
    %6 = vector.load %arg4[%c0_10, %c0_11, %c0_12] : memref<24x1x8xf32, #tpu.memory_space<vmem>>, vector<12x1x8xf32>
    %7 = vector.shape_cast %1 : vector<8x32xf32> to vector<1x8x32xf32>
    %8 = vector.broadcast %7 : vector<1x8x32xf32> to vector<12x8x32xf32>
    %cst = arith.constant dense<0.000000e+00> : vector<12x8x8xf32>
    %9 = tpu.matmul %8, %5, %cst {dimension_numbers = #tpu.dot_dimension_numbers<[2], [1], [1], [2], [0, 0, 0, 1, 1, 2], [0], [0]>} : vector<12x8x32xf32>, vector<12x32x8xf32>, vector<12x8x8xf32> -> vector<12x8x8xf32>
    %10 = vector.broadcast %6 : vector<12x1x8xf32> to vector<12x8x8xf32>
    %11 = arith.addf %9, %10 : vector<12x8x8xf32>
    %12 = vector.extract_strided_slice %11 {offsets = [0, 0, 0], sizes = [4, 8, 8], strides = [1, 1, 1]} : vector<12x8x8xf32> to vector<4x8x8xf32>
    %13 = vector.extract_strided_slice %11 {offsets = [4, 0, 0], sizes = [4, 8, 8], strides = [1, 1, 1]} : vector<12x8x8xf32> to vector<4x8x8xf32>
    %14 = vector.extract_strided_slice %11 {offsets = [8, 0, 0], sizes = [4, 8, 8], strides = [1, 1, 1]} : vector<12x8x8xf32> to vector<4x8x8xf32>
    %15 = vector.extract_strided_slice %4 {offsets = [0, 0], sizes = [1, 32], strides = [1, 1]} : vector<10x64xf32> to vector<1x32xf32>
    %cst_13 = arith.constant dense<0.000000e+00> : vector<4x8x8xf32>
    %16 = tpu.matmul %12, %13, %cst_13 {dimension_numbers = #tpu.dot_dimension_numbers<[2], [2], [1], [1], [0, 0, 0, 1, 1, 1], [0], [0]>} : vector<4x8x8xf32>, vector<4x8x8xf32>, vector<4x8x8xf32> -> vector<4x8x8xf32>
    %cst_14 = arith.constant dense<0xFF800000> : vector<4x8xf32>
    %17 = vector.multi_reduction <maximumf>, %16, %cst_14 [2] : vector<4x8x8xf32> to vector<4x8xf32>
    %18 = vector.shape_cast %17 : vector<4x8xf32> to vector<4x8x1xf32>
    %19 = vector.broadcast %18 : vector<4x8x1xf32> to vector<4x8x8xf32>
    %20 = arith.subf %16, %19 : vector<4x8x8xf32>
    %21 = math.exp %20 : vector<4x8x8xf32>
    %cst_15 = arith.constant dense<0.000000e+00> : vector<4x8xf32>
    %22 = vector.multi_reduction <add>, %21, %cst_15 [2] : vector<4x8x8xf32> to vector<4x8xf32>
    %23 = vector.shape_cast %22 : vector<4x8xf32> to vector<4x8x1xf32>
    %24 = vector.broadcast %23 : vector<4x8x1xf32> to vector<4x8x8xf32>
    %25 = arith.divf %21, %24 : vector<4x8x8xf32>
    %cst_16 = arith.constant dense<0.000000e+00> : vector<4x8x8xf32>
    %26 = tpu.matmul %25, %14, %cst_16 {dimension_numbers = #tpu.dot_dimension_numbers<[2], [1], [1], [2], [0, 0, 0, 1, 1, 2], [0], [0]>} : vector<4x8x8xf32>, vector<4x8x8xf32>, vector<4x8x8xf32> -> vector<4x8x8xf32>
    %c0_17 = arith.constant 0 : index
    %c0_18 = arith.constant 0 : index
    %c0_19 = arith.constant 0 : index
    %c0_20 = arith.constant 0 : index
    %27 = vector.load %arg5[%c0_17, %c0_18, %c0_19, %c0_20] : memref<2x4x8x32xf32, #tpu.memory_space<vmem>>, vector<1x4x8x32xf32>
    %28 = vector.shape_cast %27 : vector<1x4x8x32xf32> to vector<4x8x32xf32>
    %cst_21 = arith.constant dense<0.000000e+00> : vector<4x8x32xf32>
    %29 = tpu.matmul %26, %28, %cst_21 {dimension_numbers = #tpu.dot_dimension_numbers<[2], [1], [1], [2], [0, 0, 0, 1, 1, 2], [0], [0]>} : vector<4x8x8xf32>, vector<4x8x32xf32>, vector<4x8x32xf32> -> vector<4x8x32xf32>
    %cst_22 = arith.constant dense<0.000000e+00> : vector<8x32xf32>
    %30 = vector.multi_reduction <add>, %29, %cst_22 [0] : vector<4x8x32xf32> to vector<8x32xf32>
    %31 = vector.broadcast %15 : vector<1x32xf32> to vector<8x32xf32>
    %32 = arith.addf %30, %31 : vector<8x32xf32>
    %33 = arith.addf %1, %32 : vector<8x32xf32>
    %34 = vector.extract_strided_slice %4 {offsets = [4, 0], sizes = [1, 32], strides = [1, 1]} : vector<10x64xf32> to vector<1x32xf32>
    %35 = vector.extract_strided_slice %4 {offsets = [5, 0], sizes = [1, 32], strides = [1, 1]} : vector<10x64xf32> to vector<1x32xf32>
    %cst_23 = arith.constant dense<0.000000e+00> : vector<8xf32>
    %36 = vector.multi_reduction <add>, %33, %cst_23 [1] : vector<8x32xf32> to vector<8xf32>
    %37 = vector.shape_cast %36 : vector<8xf32> to vector<8x1xf32>
    %cst_24 = arith.constant 3.200000e+01 : f32
    %38 = vector.broadcast %cst_24 : f32 to vector<8x1xf32>
    %39 = arith.divf %37, %38 : vector<8x1xf32>
    %40 = vector.broadcast %39 : vector<8x1xf32> to vector<8x32xf32>
    %41 = arith.subf %33, %40 : vector<8x32xf32>
    %42 = arith.mulf %41, %41 : vector<8x32xf32>
    %cst_25 = arith.constant dense<0.000000e+00> : vector<8xf32>
    %43 = vector.multi_reduction <add>, %42, %cst_25 [1] : vector<8x32xf32> to vector<8xf32>
    %44 = vector.shape_cast %43 : vector<8xf32> to vector<8x1xf32>
    %cst_26 = arith.constant 3.200000e+01 : f32
    %45 = vector.broadcast %cst_26 : f32 to vector<8x1xf32>
    %46 = arith.divf %44, %45 : vector<8x1xf32>
    %47 = vector.broadcast %39 : vector<8x1xf32> to vector<8x32xf32>
    %48 = arith.subf %33, %47 : vector<8x32xf32>
    %cst_27 = arith.constant 9.99999974E-6 : f32
    %49 = vector.broadcast %cst_27 : f32 to vector<8x1xf32>
    %50 = arith.addf %46, %49 : vector<8x1xf32>
    %51 = math.rsqrt %50 : vector<8x1xf32>
    %52 = vector.broadcast %51 : vector<8x1xf32> to vector<8x32xf32>
    %53 = arith.mulf %48, %52 : vector<8x32xf32>
    %54 = vector.broadcast %34 : vector<1x32xf32> to vector<8x32xf32>
    %55 = arith.mulf %53, %54 : vector<8x32xf32>
    %56 = vector.broadcast %35 : vector<1x32xf32> to vector<8x32xf32>
    %57 = arith.addf %55, %56 : vector<8x32xf32>
    %c12 = arith.constant 12 : index
    %c0_28 = arith.constant 0 : index
    %c0_29 = arith.constant 0 : index
    %58 = vector.load %arg3[%c12, %c0_28, %c0_29] : memref<24x32x8xf32, #tpu.memory_space<vmem>>, vector<4x32x8xf32>
    %c12_30 = arith.constant 12 : index
    %c0_31 = arith.constant 0 : index
    %c0_32 = arith.constant 0 : index
    %59 = vector.load %arg4[%c12_30, %c0_31, %c0_32] : memref<24x1x8xf32, #tpu.memory_space<vmem>>, vector<4x1x8xf32>
    %60 = vector.shape_cast %57 : vector<8x32xf32> to vector<1x8x32xf32>
    %61 = vector.broadcast %60 : vector<1x8x32xf32> to vector<4x8x32xf32>
    %cst_33 = arith.constant dense<0.000000e+00> : vector<4x8x8xf32>
    %62 = tpu.matmul %61, %58, %cst_33 {dimension_numbers = #tpu.dot_dimension_numbers<[2], [1], [1], [2], [0, 0, 0, 1, 1, 2], [0], [0]>} : vector<4x8x32xf32>, vector<4x32x8xf32>, vector<4x8x8xf32> -> vector<4x8x8xf32>
    %63 = vector.broadcast %59 : vector<4x1x8xf32> to vector<4x8x8xf32>
    %64 = arith.addf %62, %63 : vector<4x8x8xf32>
    %c16 = arith.constant 16 : index
    %c0_34 = arith.constant 0 : index
    %c0_35 = arith.constant 0 : index
    %65 = vector.load %arg3[%c16, %c0_34, %c0_35] : memref<24x32x8xf32, #tpu.memory_space<vmem>>, vector<8x32x8xf32>
    %c16_36 = arith.constant 16 : index
    %c0_37 = arith.constant 0 : index
    %c0_38 = arith.constant 0 : index
    %66 = vector.load %arg4[%c16_36, %c0_37, %c0_38] : memref<24x1x8xf32, #tpu.memory_space<vmem>>, vector<8x1x8xf32>
    %67 = vector.shape_cast %3 : vector<6x32xf32> to vector<1x6x32xf32>
    %68 = vector.broadcast %67 : vector<1x6x32xf32> to vector<8x6x32xf32>
    %cst_39 = arith.constant dense<0.000000e+00> : vector<8x6x8xf32>
    %69 = tpu.matmul %68, %65, %cst_39 {dimension_numbers = #tpu.dot_dimension_numbers<[2], [1], [1], [2], [0, 0, 0, 1, 1, 2], [0], [0]>} : vector<8x6x32xf32>, vector<8x32x8xf32>, vector<8x6x8xf32> -> vector<8x6x8xf32>
    %70 = vector.broadcast %66 : vector<8x1x8xf32> to vector<8x6x8xf32>
    %71 = arith.addf %69, %70 : vector<8x6x8xf32>
    %72 = vector.extract_strided_slice %71 {offsets = [0, 0, 0], sizes = [4, 6, 8], strides = [1, 1, 1]} : vector<8x6x8xf32> to vector<4x6x8xf32>
    %73 = vector.extract_strided_slice %71 {offsets = [4, 0, 0], sizes = [4, 6, 8], strides = [1, 1, 1]} : vector<8x6x8xf32> to vector<4x6x8xf32>
    %74 = vector.extract_strided_slice %4 {offsets = [1, 0], sizes = [1, 32], strides = [1, 1]} : vector<10x64xf32> to vector<1x32xf32>
    %cst_40 = arith.constant dense<0.000000e+00> : vector<4x8x6xf32>
    %75 = tpu.matmul %64, %72, %cst_40 {dimension_numbers = #tpu.dot_dimension_numbers<[2], [2], [1], [1], [0, 0, 0, 1, 1, 1], [0], [0]>} : vector<4x8x8xf32>, vector<4x6x8xf32>, vector<4x8x6xf32> -> vector<4x8x6xf32>
    %cst_41 = arith.constant dense<0xFF800000> : vector<4x8xf32>
    %76 = vector.multi_reduction <maximumf>, %75, %cst_41 [2] : vector<4x8x6xf32> to vector<4x8xf32>
    %77 = vector.shape_cast %76 : vector<4x8xf32> to vector<4x8x1xf32>
    %78 = vector.broadcast %77 : vector<4x8x1xf32> to vector<4x8x6xf32>
    %79 = arith.subf %75, %78 : vector<4x8x6xf32>
    %80 = math.exp %79 : vector<4x8x6xf32>
    %cst_42 = arith.constant dense<0.000000e+00> : vector<4x8xf32>
    %81 = vector.multi_reduction <add>, %80, %cst_42 [2] : vector<4x8x6xf32> to vector<4x8xf32>
    %82 = vector.shape_cast %81 : vector<4x8xf32> to vector<4x8x1xf32>
    %83 = vector.broadcast %82 : vector<4x8x1xf32> to vector<4x8x6xf32>
    %84 = arith.divf %80, %83 : vector<4x8x6xf32>
    %cst_43 = arith.constant dense<0.000000e+00> : vector<4x8x8xf32>
    %85 = tpu.matmul %84, %73, %cst_43 {dimension_numbers = #tpu.dot_dimension_numbers<[2], [1], [1], [2], [0, 0, 0, 1, 1, 2], [0], [0]>} : vector<4x8x6xf32>, vector<4x6x8xf32>, vector<4x8x8xf32> -> vector<4x8x8xf32>
    %c1 = arith.constant 1 : index
    %c0_44 = arith.constant 0 : index
    %c0_45 = arith.constant 0 : index
    %c0_46 = arith.constant 0 : index
    %86 = vector.load %arg5[%c1, %c0_44, %c0_45, %c0_46] : memref<2x4x8x32xf32, #tpu.memory_space<vmem>>, vector<1x4x8x32xf32>
    %87 = vector.shape_cast %86 : vector<1x4x8x32xf32> to vector<4x8x32xf32>
    %cst_47 = arith.constant dense<0.000000e+00> : vector<4x8x32xf32>
    %88 = tpu.matmul %85, %87, %cst_47 {dimension_numbers = #tpu.dot_dimension_numbers<[2], [1], [1], [2], [0, 0, 0, 1, 1, 2], [0], [0]>} : vector<4x8x8xf32>, vector<4x8x32xf32>, vector<4x8x32xf32> -> vector<4x8x32xf32>
    %cst_48 = arith.constant dense<0.000000e+00> : vector<8x32xf32>
    %89 = vector.multi_reduction <add>, %88, %cst_48 [0] : vector<4x8x32xf32> to vector<8x32xf32>
    %90 = vector.broadcast %74 : vector<1x32xf32> to vector<8x32xf32>
    %91 = arith.addf %89, %90 : vector<8x32xf32>
    %92 = arith.addf %57, %91 : vector<8x32xf32>
    %93 = vector.extract_strided_slice %4 {offsets = [6, 0], sizes = [1, 32], strides = [1, 1]} : vector<10x64xf32> to vector<1x32xf32>
    %94 = vector.extract_strided_slice %4 {offsets = [7, 0], sizes = [1, 32], strides = [1, 1]} : vector<10x64xf32> to vector<1x32xf32>
    %cst_49 = arith.constant dense<0.000000e+00> : vector<8xf32>
    %95 = vector.multi_reduction <add>, %92, %cst_49 [1] : vector<8x32xf32> to vector<8xf32>
    %96 = vector.shape_cast %95 : vector<8xf32> to vector<8x1xf32>
    %cst_50 = arith.constant 3.200000e+01 : f32
    %97 = vector.broadcast %cst_50 : f32 to vector<8x1xf32>
    %98 = arith.divf %96, %97 : vector<8x1xf32>
    %99 = vector.broadcast %98 : vector<8x1xf32> to vector<8x32xf32>
    %100 = arith.subf %92, %99 : vector<8x32xf32>
    %101 = arith.mulf %100, %100 : vector<8x32xf32>
    %cst_51 = arith.constant dense<0.000000e+00> : vector<8xf32>
    %102 = vector.multi_reduction <add>, %101, %cst_51 [1] : vector<8x32xf32> to vector<8xf32>
    %103 = vector.shape_cast %102 : vector<8xf32> to vector<8x1xf32>
    %cst_52 = arith.constant 3.200000e+01 : f32
    %104 = vector.broadcast %cst_52 : f32 to vector<8x1xf32>
    %105 = arith.divf %103, %104 : vector<8x1xf32>
    %106 = vector.broadcast %98 : vector<8x1xf32> to vector<8x32xf32>
    %107 = arith.subf %92, %106 : vector<8x32xf32>
    %cst_53 = arith.constant 9.99999974E-6 : f32
    %108 = vector.broadcast %cst_53 : f32 to vector<8x1xf32>
    %109 = arith.addf %105, %108 : vector<8x1xf32>
    %110 = math.rsqrt %109 : vector<8x1xf32>
    %111 = vector.broadcast %110 : vector<8x1xf32> to vector<8x32xf32>
    %112 = arith.mulf %107, %111 : vector<8x32xf32>
    %113 = vector.broadcast %93 : vector<1x32xf32> to vector<8x32xf32>
    %114 = arith.mulf %112, %113 : vector<8x32xf32>
    %115 = vector.broadcast %94 : vector<1x32xf32> to vector<8x32xf32>
    %116 = arith.addf %114, %115 : vector<8x32xf32>
    %c0_54 = arith.constant 0 : index
    %c0_55 = arith.constant 0 : index
    %117 = vector.load %arg6[%c0_54, %c0_55] : memref<32x64xf32, #tpu.memory_space<vmem>>, vector<32x64xf32>
    %cst_56 = arith.constant dense<0.000000e+00> : vector<8x64xf32>
    %118 = tpu.matmul %116, %117, %cst_56 {dimension_numbers = #tpu.dot_dimension_numbers<[1], [0], [0], [1], [0, 0, 1, 1], [], []>} : vector<8x32xf32>, vector<32x64xf32>, vector<8x64xf32> -> vector<8x64xf32>
    %119 = vector.extract_strided_slice %4 {offsets = [2, 0], sizes = [1, 64], strides = [1, 1]} : vector<10x64xf32> to vector<1x64xf32>
    %120 = vector.broadcast %119 : vector<1x64xf32> to vector<8x64xf32>
    %121 = arith.addf %118, %120 : vector<8x64xf32>
    %cst_57 = arith.constant 5.000000e-01 : f32
    %122 = vector.broadcast %cst_57 : f32 to vector<8x64xf32>
    %123 = arith.mulf %122, %121 : vector<8x64xf32>
    %cst_58 = arith.constant 0.707106769 : f32
    %124 = vector.broadcast %cst_58 : f32 to vector<8x64xf32>
    %125 = arith.mulf %121, %124 : vector<8x64xf32>
    %126 = math.absf %125 : vector<8x64xf32>
    %cst_59 = arith.constant 0.327591091 : f32
    %127 = vector.broadcast %cst_59 : f32 to vector<8x64xf32>
    %128 = arith.mulf %127, %126 : vector<8x64xf32>
    %cst_60 = arith.constant 1.000000e+00 : f32
    %129 = vector.broadcast %cst_60 : f32 to vector<8x64xf32>
    %130 = arith.addf %129, %128 : vector<8x64xf32>
    %cst_61 = arith.constant 1.000000e+00 : f32
    %131 = vector.broadcast %cst_61 : f32 to vector<8x64xf32>
    %132 = arith.divf %131, %130 : vector<8x64xf32>
    %cst_62 = arith.constant 1.06140542 : f32
    %133 = vector.broadcast %cst_62 : f32 to vector<8x64xf32>
    %134 = arith.mulf %133, %132 : vector<8x64xf32>
    %cst_63 = arith.constant -1.45315206 : f32
    %135 = vector.broadcast %cst_63 : f32 to vector<8x64xf32>
    %136 = arith.addf %134, %135 : vector<8x64xf32>
    %137 = arith.mulf %136, %132 : vector<8x64xf32>
    %cst_64 = arith.constant 1.42141378 : f32
    %138 = vector.broadcast %cst_64 : f32 to vector<8x64xf32>
    %139 = arith.addf %137, %138 : vector<8x64xf32>
    %140 = arith.mulf %139, %132 : vector<8x64xf32>
    %cst_65 = arith.constant -0.284496725 : f32
    %141 = vector.broadcast %cst_65 : f32 to vector<8x64xf32>
    %142 = arith.addf %140, %141 : vector<8x64xf32>
    %143 = arith.mulf %142, %132 : vector<8x64xf32>
    %cst_66 = arith.constant 0.254829586 : f32
    %144 = vector.broadcast %cst_66 : f32 to vector<8x64xf32>
    %145 = arith.addf %143, %144 : vector<8x64xf32>
    %146 = arith.mulf %145, %132 : vector<8x64xf32>
    %cst_67 = arith.constant 0.000000e+00 : f32
    %147 = vector.broadcast %cst_67 : f32 to vector<8x64xf32>
    %148 = arith.subf %147, %126 : vector<8x64xf32>
    %149 = arith.mulf %148, %126 : vector<8x64xf32>
    %150 = math.exp %149 : vector<8x64xf32>
    %151 = arith.mulf %146, %150 : vector<8x64xf32>
    %cst_68 = arith.constant 1.000000e+00 : f32
    %152 = vector.broadcast %cst_68 : f32 to vector<8x64xf32>
    %153 = arith.subf %152, %151 : vector<8x64xf32>
    %cst_69 = arith.constant 0.000000e+00 : f32
    %154 = vector.broadcast %cst_69 : f32 to vector<8x64xf32>
    %155 = arith.cmpf oge, %125, %154 : vector<8x64xf32>
    %cst_70 = arith.constant 0.000000e+00 : f32
    %156 = vector.broadcast %cst_70 : f32 to vector<8x64xf32>
    %157 = arith.subf %156, %153 : vector<8x64xf32>
    %158 = arith.select %155, %153, %157 : vector<8x64xi1>, vector<8x64xf32>
    %cst_71 = arith.constant 1.000000e+00 : f32
    %159 = vector.broadcast %cst_71 : f32 to vector<8x64xf32>
    %160 = arith.addf %159, %158 : vector<8x64xf32>
    %161 = arith.mulf %123, %160 : vector<8x64xf32>
    %c0_72 = arith.constant 0 : index
    %c0_73 = arith.constant 0 : index
    %162 = vector.load %arg7[%c0_72, %c0_73] : memref<64x32xf32, #tpu.memory_space<vmem>>, vector<64x32xf32>
    %cst_74 = arith.constant dense<0.000000e+00> : vector<8x32xf32>
    %163 = tpu.matmul %161, %162, %cst_74 {dimension_numbers = #tpu.dot_dimension_numbers<[1], [0], [0], [1], [0, 0, 1, 1], [], []>} : vector<8x64xf32>, vector<64x32xf32>, vector<8x32xf32> -> vector<8x32xf32>
    %164 = vector.extract_strided_slice %4 {offsets = [3, 0], sizes = [1, 32], strides = [1, 1]} : vector<10x64xf32> to vector<1x32xf32>
    %165 = vector.broadcast %164 : vector<1x32xf32> to vector<8x32xf32>
    %166 = arith.addf %163, %165 : vector<8x32xf32>
    %167 = arith.addf %116, %166 : vector<8x32xf32>
    %168 = vector.extract_strided_slice %4 {offsets = [8, 0], sizes = [1, 32], strides = [1, 1]} : vector<10x64xf32> to vector<1x32xf32>
    %169 = vector.extract_strided_slice %4 {offsets = [9, 0], sizes = [1, 32], strides = [1, 1]} : vector<10x64xf32> to vector<1x32xf32>
    %cst_75 = arith.constant dense<0.000000e+00> : vector<8xf32>
    %170 = vector.multi_reduction <add>, %167, %cst_75 [1] : vector<8x32xf32> to vector<8xf32>
    %171 = vector.shape_cast %170 : vector<8xf32> to vector<8x1xf32>
    %cst_76 = arith.constant 3.200000e+01 : f32
    %172 = vector.broadcast %cst_76 : f32 to vector<8x1xf32>
    %173 = arith.divf %171, %172 : vector<8x1xf32>
    %174 = vector.broadcast %173 : vector<8x1xf32> to vector<8x32xf32>
    %175 = arith.subf %167, %174 : vector<8x32xf32>
    %176 = arith.mulf %175, %175 : vector<8x32xf32>
    %cst_77 = arith.constant dense<0.000000e+00> : vector<8xf32>
    %177 = vector.multi_reduction <add>, %176, %cst_77 [1] : vector<8x32xf32> to vector<8xf32>
    %178 = vector.shape_cast %177 : vector<8xf32> to vector<8x1xf32>
    %cst_78 = arith.constant 3.200000e+01 : f32
    %179 = vector.broadcast %cst_78 : f32 to vector<8x1xf32>
    %180 = arith.divf %178, %179 : vector<8x1xf32>
    %181 = vector.broadcast %173 : vector<8x1xf32> to vector<8x32xf32>
    %182 = arith.subf %167, %181 : vector<8x32xf32>
    %cst_79 = arith.constant 9.99999974E-6 : f32
    %183 = vector.broadcast %cst_79 : f32 to vector<8x1xf32>
    %184 = arith.addf %180, %183 : vector<8x1xf32>
    %185 = math.rsqrt %184 : vector<8x1xf32>
    %186 = vector.broadcast %185 : vector<8x1xf32> to vector<8x32xf32>
    %187 = arith.mulf %182, %186 : vector<8x32xf32>
    %188 = vector.broadcast %168 : vector<1x32xf32> to vector<8x32xf32>
    %189 = arith.mulf %187, %188 : vector<8x32xf32>
    %190 = vector.broadcast %169 : vector<1x32xf32> to vector<8x32xf32>
    %191 = arith.addf %189, %190 : vector<8x32xf32>
    %c0_80 = arith.constant 0 : index
    %c0_81 = arith.constant 0 : index
    %c0_82 = arith.constant 0 : index
    %192 = vector.load %arg9[%c0_80, %c0_81, %c0_82] : memref<1x8x32xf32, #tpu.memory_space<vmem>>, vector<1x8x32xf32>
    %193 = vector.shape_cast %192 : vector<1x8x32xf32> to vector<8x32xf32>
    %194 = vector.shape_cast %191 : vector<8x32xf32> to vector<1x8x32xf32>
    tpu.vector_store %arg9[%c0_80, %c0_81, %c0_82], %194 {strides = array<i32>} : memref<1x8x32xf32, #tpu.memory_space<vmem>>, vector<1x8x32xf32>,
    return
  }
  func.func @transform_0(%arg0: i32) -> (i32, i32, i32) {
    %c0_i32 = arith.constant 0 : i32
    %c0_i32_0 = arith.constant 0 : i32
    %c0_i32_1 = arith.constant 0 : i32
    return %arg0, %c0_i32, %c0_i32_0 : i32, i32, i32
  }
  func.func @transform_1(%arg0: i32) -> (i32, i32, i32) {
    %c0_i32 = arith.constant 0 : i32
    %c0_i32_0 = arith.constant 0 : i32
    %c0_i32_1 = arith.constant 0 : i32
    return %arg0, %c0_i32, %c0_i32_0 : i32, i32, i32
  }
  func.func @transform_2(%arg0: i32) -> (i32, i32, i32) {
    %c0_i32 = arith.constant 0 : i32
    %c0_i32_0 = arith.constant 0 : i32
    %c0_i32_1 = arith.constant 0 : i32
    %c0_i32_2 = arith.constant 0 : i32
    return %c0_i32, %c0_i32_0, %c0_i32_1 : i32, i32, i32
  }
  func.func @transform_3(%arg0: i32) -> (i32, i32, i32) {
    %c0_i32 = arith.constant 0 : i32
    %c0_i32_0 = arith.constant 0 : i32
    %c0_i32_1 = arith.constant 0 : i32
    %c0_i32_2 = arith.constant 0 : i32
    return %c0_i32, %c0_i32_0, %c0_i32_1 : i32, i32, i32
  }
  func.func @transform_4(%arg0: i32) -> (i32, i32, i32, i32) {
    %c0_i32 = arith.constant 0 : i32
    %c0_i32_0 = arith.constant 0 : i32
    %c0_i32_1 = arith.constant 0 : i32
    %c0_i32_2 = arith.constant 0 : i32
    %c0_i32_3 = arith.constant 0 : i32
    return %c0_i32, %c0_i32_0, %c0_i32_1, %c0_i32_2 : i32, i32, i32, i32
  }
  func.func @transform_5(%arg0: i32) -> (i32, i32) {
    %c0_i32 = arith.constant 0 : i32
    %c0_i32_0 = arith.constant 0 : i32
    %c0_i32_1 = arith.constant 0 : i32
    return %c0_i32, %c0_i32_0 : i32, i32
  }
  func.func @transform_6(%arg0: i32) -> (i32, i32) {
    %c0_i32 = arith.constant 0 : i32
    %c0_i32_0 = arith.constant 0 : i32
    %c0_i32_1 = arith.constant 0 : i32
    return %c0_i32, %c0_i32_0 : i32, i32
  }
  func.func @transform_7(%arg0: i32) -> (i32, i32) {
    %c0_i32 = arith.constant 0 : i32
    %c0_i32_0 = arith.constant 0 : i32
    %c0_i32_1 = arith.constant 0 : i32
    return %c0_i32, %c0_i32_0 : i32, i32
  }
  func.func @transform_8(%arg0: i32) -> (i32, i32, i32) {
    %c0_i32 = arith.constant 0 : i32
    %c0_i32_0 = arith.constant 0 : i32
    %c0_i32_1 = arith.constant 0 : i32
    return %arg0, %c0_i32, %c0_i32_0 : i32, i32, i32
  }
}

</mosaic_0001>

<bundles_post_ra>
// kernel: tpu_custom_call.1
= control target key start
LH: loop header
LB: loop body
LE: loop exit
PB: predicated region body
PF: predicated region fallthrough
CT: control target
= control target key end

     0   :  { %13 = vsyncpa [#allocation3], 0  ;;  %s3128_s0 = inlined_call_operand.vmem [shape: f32[2,8,32], index: 0, kind: input, shape index: {}]   ;;  %s3129_s1 = inlined_call_operand.vmem [shape: f32[2,6,32], index: 1, kind: input, shape index: {}]   ;;  %s3130_s2 = inlined_call_operand.vmem [shape: f32[24,32,8], index: 2, kind: input, shape index: {}]   ;;  %s3131_s3 = inlined_call_operand.vmem [shape: f32[24,1,8], index: 3, kind: input, shape index: {}]   ;;  %s3132_s4 = inlined_call_operand.vmem [shape: f32[2,4,8,32], index: 4, kind: input, shape index: {}]   ;;  %s3133_s5 = inlined_call_operand.vmem [shape: f32[32,64], index: 5, kind: input, shape index: {}]   ;;  %s3134_s6 = inlined_call_operand.vmem [shape: f32[64,32], index: 6, kind: input, shape index: {}]   ;;  %s3135_s7 = inlined_call_operand.vmem [shape: f32[10,64], index: 7, kind: input, shape index: {}]   ;;  %s3136_s8 = inlined_call_operand.hbm [shape: f32[2,8,32], index: 8, kind: output, shape index: {}]  }
   0x1   :  { %15 = vsyncpa [#allocation3 + $0x1], 0  ;;  %s2450_s27 = smov 0   ;;  %s2452_s28 = smov 0  }
   0x2   :  { %s2454_s29 = smov 0   ;;  %s2456_s30 = smov 0  }
   0x3 LB: > { %s2471_s9 = sadd.s32 4294967295, %s2402_s30   ;;  %s2095_s10 = sadd.s32 4294967294, %s2402_s30   ;;  %s2402_s30 = sphi %s2456_s30, %s3142_s30   ;;  %s2398_s29 = sphi %s2454_s29, %s3141_s29   ;;  %s2394_s28 = sphi %s2452_s28, %s3140_s28   ;;  %s2390_s27 = sphi %s2450_s27, %s3139_s27  }
   0x4   : > { %s2475_s11 = sadd.s32 1, %s2402_s30   ;;  %s206_s12 = sadd.s32 1, %s2398_s29 }
   0x5   : > { %s203_s13 = ssub.s32 %s2402_s30, %s2475_s11  ;;  %p216_p0 = scmp.ne.s32.totalorder %s2398_s29, %s2394_s28 }
   0x6   : > { %p204_p1 = scmp.eq.s32.totalorder %s203_s13, 0  ;;  %p217_p2 = scmp.eq.s32.totalorder %s2471_s9, 1 }
   0x7   : > { %p222_p3 = scmp.ne.s32.totalorder %s2394_s28, %s2390_s27  ;;  %p223_p4 = scmp.eq.s32.totalorder %s2095_s10, 1 }
   0x8   : > { %s2486_s14 = scalar_select %p204_p1, %s2398_s29, %s206_s12  }
   0x9   : > { %p2488_p5 = por %p217_p2, %p216_p0  ;;  %p2492_p6 = por %p223_p4, %p222_p3 }
   0xa   : > { %p2098_p7 = scmp.ge.s32.totalorder %s2402_s30, 1  ;;  %p273_p8 = scmp.lt.s32.totalorder %s2402_s30, 3 }
   0xc   : > { %p274_p9 = pnand %p2098_p7, %p273_p8 }
   0xd   : > { %p310_p10 = scmp.lt.s32.totalorder (!%p274_p9), %s2471_s9, 1  ;;  %s307_s26 = sand.u32 (!%p274_p9), 1, %s2394_s28  }
   0xe   : > { %277 = sbr.rel (%p274_p9) target bundleno = 2791 (0xae7), region = 52  ;;  %s2099_s10 = sshll.u32 (!%p274_p9), %s307_s26, 3 }
   0xf   : > { %s2229_s18 = sshll.u32 (!%p274_p9), %s2471_s9, 3  ;;  %s309_s23 = scalar_lea.vmem (!%p274_p9), [#allocation2], %s2099_s10 }
  0x10   : > { %s2360_s10 = scalar_lea.hbm (!%p274_p9), %s3136_s8, 16 }
  0x13   : > { %v325_v0 = vld [vmem:[%s3130_s2 + $0x18] sm:$0xff]  ;;  %v324_v2 = vld [vmem:[%s3130_s2 + $0x10] sm:$0xff]  ;;  %v323_v5 = vld [vmem:[%s3130_s2 + $0x8] sm:$0xff]  ;;  %s2527_s22 = scalar_select %p310_p10, %s2471_s9, 1  ;;  %vm418_vm0 = vcmask 261120   ;;  %vm662_vm1 = vcmask 64512  }
  0x14   : > { %v329_v1 = vld [vmem:[%s3130_s2 + $0x38] sm:$0xff]  ;;  %434 = vmatpush.msra.mxu0 %v325_v0  ;;  %v328_v3 = vld [vmem:[%s3130_s2 + $0x30] sm:$0xff]  ;;  %v327_v6 = vld [vmem:[%s3130_s2 + $0x28] sm:$0xff]  ;;  %s2009_s9 = scalar_lea.sflag [#allocation3], %s307_s26 }
  0x15   : > { %454 = vmatpush.msra.mxu2 %v329_v1  ;;  %v345_v4 = vld [vmem:[%s3130_s2 + $0xb8] sm:$0xff]  ;;  %v344_v8 = vld [vmem:[%s3130_s2 + $0xb0] sm:$0xff]  ;;  %v322_v10 = vld [vmem:[%s3130_s2] sm:$0xff]  ;;  %s2100_s13 = sshll.u32 %s2527_s22, 3  ;;  %s2021_s22 = sshll.u32 %s309_s23, 4  ;;  %s2022_s22 = int_to_ptr.vmem [resolvable:$true] %s2021_s22 }
  0x16   : > { %534 = vmatpush.msra.mxu1 %v345_v4  ;;  %v337_v7 = vld [vmem:[%s3130_s2 + $0x78] sm:$0xff]  ;;  %435 = vmatpush.msra.mxu0 %v324_v2  ;;  %v336_v9 = vld [vmem:[%s3130_s2 + $0x70] sm:$0xff]  ;;  %v326_v11 = vld [vmem:[%s3130_s2 + $0x20] sm:$0xff]  ;;  %s313_s21 = scalar_lea.vmem %s3128_s0, %s2100_s13  ;;  %s317_s20 = scalar_lea.vmem %s3129_s1, %s2100_s13 }
  0x17   : > { %455 = vmatpush.msra.mxu2 %v328_v3  ;;  %494 = vmatpush.msra.mxu3 %v337_v7  ;;  %v343_v12 = vld [vmem:[%s3130_s2 + $0xa8] sm:$0xff]  ;;  %v2547_v13 = vld [vmem:[%s313_s21] sm:$0xff]  ;;  %v333_v14 = vld [vmem:[%s3130_s2 + $0x58] sm:$0xff]  ;;  %s2019_s21 = scalar_lea.hbm %s3136_s8, %s2229_s18 }
  0x18   : > { %535 = vmatpush.msra.mxu1 %v344_v8  ;;  %436 = vmatpush.msra.mxu0 %v323_v5  ;;  %v341_v15 = vld [vmem:[%s3130_s2 + $0x98] sm:$0xff]  ;;  %v335_v16 = vld [vmem:[%s3130_s2 + $0x68] sm:$0xff]  ;;  %v342_v17 = vld [vmem:[%s3130_s2 + $0xa0] sm:$0xff]  ;;  %s2023_s24 = sshll.u32 %s2019_s21, 4  ;;  %s2024_s24 = int_to_ptr.hbm [resolvable:$true] %s2023_s24 }
  0x19   : > { %456 = vmatpush.msra.mxu2 %v327_v6  ;;  %495 = vmatpush.msra.mxu3 %v336_v9  ;;  %v332_v18 = vld [vmem:[%s3130_s2 + $0x50] sm:$0xff]  ;;  %v334_v20 = vld [vmem:[%s3130_s2 + $0x60] sm:$0xff]  ;;  %v331_v21 = vld [vmem:[%s3130_s2 + $0x48] sm:$0xff]  ;;  %s2354_s13 = sshra.s32 %s2024_s24, 4  ;;  %s2355_s13 = int_to_ptr.hbm [resolvable:$true] %s2354_s13 }
  0x1a   : > { %536 = vmatpush.msra.mxu1 %v343_v12  ;;  %437 = vmatpush.msra.mxu0 %v322_v10  ;;  %v340_v19 = vld [vmem:[%s3130_s2 + $0x90] sm:$0xff]  ;;  %v339_v22 = vld [vmem:[%s3130_s2 + $0x88] sm:$0xff]  ;;  %v353_v23 = vld [vmem:[%s3130_s2 + $0xf8] sm:$0xff]  ;;  %s2356_s25 = scalar_lea.hbm %s2355_s13, 8  ;;  %p2361_p0 = scmp.lt.s32.totalorder %s2355_s13, %s3136_s8 }
  0x1b   : > { %457 = vmatpush.msra.mxu2 %v326_v11  ;;  %2102 = vmatmul.msk.f32.vlgmr.msra.gmra.mxu0 %vm418_vm0, %v2547_v13  ;;  %v330_v24 = vld [vmem:[%s3130_s2 + $0x40] sm:$0xff]  ;;  %v352_v26 = vld [vmem:[%s3130_s2 + $0xf0] sm:$0xff]  ;;  %v361_v27 = vld [vmem:[%s3130_s2 + $0x138] sm:$0xff]  ;;  %p2357_p11 = scmp.ne.s32.totalorder %s2355_s13, %s2356_s25  ;;  %p2362_p1 = scmp.lt.s32.totalorder %s2360_s10, %s2356_s25 }
  0x1c   : > { %2103 = vmatmul.msk.f32.vlgmr.msra.gmra.mxu2 %vm418_vm0, %v2547_v13  ;;  %514 = vmatpush.msrb.mxu0 %v341_v15  ;;  %v338_v25 = vld [vmem:[%s3130_s2 + $0x80] sm:$0xff]  ;;  %v349_v28 = vld [vmem:[%s3130_s2 + $0xd8] sm:$0xff]  ;;  %v360_v29 = vld [vmem:[%s3130_s2 + $0x130] sm:$0xff] }
  0x1d   : > { %474 = vmatpush.msrb.mxu2 %v333_v14  ;;  %496 = vmatpush.msra.mxu3 %v335_v16  ;;  %v351_v30 = vld [vmem:[%s3130_s2 + $0xe8] sm:$0xff]  ;;  %v357_v31 = vld [vmem:[%s3130_s2 + $0x118] sm:$0xff]  ;;  %v348_v32 = vld [vmem:[%s3130_s2 + $0xd0] sm:$0xff]  ;;  %p2358_p12 = pnand %p2357_p11, %p2488_p5  ;;  %p2363_p2 = por %p2362_p1, %p2361_p0 }
  0x1e   : > { %537 = vmatpush.msra.mxu1 %v342_v17  ;;  %515 = vmatpush.msrb.mxu0 %v340_v19  ;;  %v359_v33 = vld [vmem:[%s3130_s2 + $0x128] sm:$0xff]  ;;  %v350_v34 = vld [vmem:[%s3130_s2 + $0xe0] sm:$0xff]  ;;  %v356_v38 = vld [vmem:[%s3130_s2 + $0x110] sm:$0xff] }
  0x1f   : > { %475 = vmatpush.msrb.mxu2 %v332_v18  ;;  %2107 = vmatmul.msk.f32.vlgmr.msra.gmra.mxu1 %vm418_vm0, %v2547_v13  ;;  %v347_v35 = vld [vmem:[%s3130_s2 + $0xc8] sm:$0xff]  ;;  %v346_v36 = vld [vmem:[%s3130_s2 + $0xc0] sm:$0xff]  ;;  %v369_v41 = vld [vmem:[%s3130_s2 + $0x178] sm:$0xff]  ;;  %p2359_p13 = pneg %p2358_p12 }
  0x20   : > { %497 = vmatpush.msra.mxu3 %v334_v20  ;;  %516 = vmatpush.msrb.mxu0 %v339_v22  ;;  %v358_v37 = vld [vmem:[%s3130_s2 + $0x120] sm:$0xff]  ;;  %v355_v39 = vld [vmem:[%s3130_s2 + $0x108] sm:$0xff]  ;;  %v368_v42 = vld [vmem:[%s3130_s2 + $0x170] sm:$0xff] }
  0x21   : > { %476 = vmatpush.msrb.mxu2 %v331_v21  ;;  %2105 = vmatmul.msk.f32.vlgmr.msra.gmra.mxu3 %vm418_vm0, %v2547_v13  ;;  %v354_v40 = vld [vmem:[%s3130_s2 + $0x100] sm:$0xff]  ;;  %v365_v43 = vld [vmem:[%s3130_s2 + $0x158] sm:$0xff]  ;;  %v367_v44 = vld [vmem:[%s3130_s2 + $0x168] sm:$0xff]  ;;  %p2364_p3 = pnand %p2363_p2, %p2359_p13 }
  0x22   : > { %574 = vmatpush.msrb.mxu3 %v353_v23  ;;  %614 = vmatpush.msrb.mxu1 %v361_v27  ;;  %v364_v45 = vld [vmem:[%s3130_s2 + $0x150] sm:$0xff]  ;;  %v366_v46 = vld [vmem:[%s3130_s2 + $0x160] sm:$0xff]  ;;  %v363_v47 = vld [vmem:[%s3130_s2 + $0x148] sm:$0xff] }
  0x23   : > { %477 = vmatpush.msrb.mxu2 %v330_v24  ;;  %517 = vmatpush.msrb.mxu0 %v338_v25  ;;  %v362_v48 = vld [vmem:[%s3130_s2 + $0x140] sm:$0xff]  ;;  %v2280_v9 = vld [vmem:[%s3131_s3 + $0x9] ss:$0 sm:$0xff]  ;;  %v2281_v12 = vld [vmem:[%s3131_s3 + $0x8] ss:$0 sm:$0xff] }
  0x24   : > { %2104 = vmatmul.msk.f32.vlgmr.msrb.gmra.mxu2 %vm418_vm0, %v2547_v13  ;;  %2106 = vmatmul.msk.f32.vlgmr.msrb.gmra.mxu0 %vm418_vm0, %v2547_v13  ;;  %v2273_v50 = vld [vmem:[%s3131_s3 + $0x5] ss:$0 sm:$0xff]  ;;  %v2274_v51 = vld [vmem:[%s3131_s3 + $0x1] ss:$0 sm:$0xff]  ;;  %v2275_v55 = vld [vmem:[%s3131_s3 + $0x4] ss:$0 sm:$0xff] }
  0x25   : > { %575 = vmatpush.msrb.mxu3 %v352_v26  ;;  %554 = vmatpush.msra.mxu2 %v349_v28  ;;  %v2272_v56 = vld [vmem:[%s3131_s3] ss:$0 sm:$0xff]  ;;  %v2278_v63 = vld [vmem:[%s3131_s3 + $0x7] ss:$0 sm:$0xff]  ;;  %v2276_v0 = vld [vmem:[%s3131_s3 + $0x3] ss:$0 sm:$0xff] }
  0x26   : > { %615 = vmatpush.msrb.mxu1 %v360_v29  ;;  %594 = vmatpush.msra.mxu0 %v357_v31  ;;  %v2279_v2 = vld [vmem:[%s3131_s3 + $0x6] ss:$0 sm:$0xff]  ;;  %v2277_v5 = vld [vmem:[%s3131_s3 + $0x2] ss:$0 sm:$0xff]  ;;  %v2282_v16 = vld [vmem:[%s3131_s3 + $0xb] ss:$0 sm:$0xff] }
  0x27   : > { %576 = vmatpush.msrb.mxu3 %v351_v30  ;;  %555 = vmatpush.msra.mxu2 %v348_v32  ;;  %v2283_v19 = vld [vmem:[%s3131_s3 + $0xa] ss:$0 sm:$0xff] }
  0x28   : > { %616 = vmatpush.msrb.mxu1 %v359_v33  ;;  %595 = vmatpush.msra.mxu0 %v356_v38 }
  0x29   : > { %577 = vmatpush.msrb.mxu3 %v350_v34  ;;  %556 = vmatpush.msra.mxu2 %v347_v35 }
  0x2a   : > { %2109 = vmatmul.msk.f32.vlgmr.msrb.gmra.mxu3 %vm418_vm0, %v2547_v13  ;;  %617 = vmatpush.msrb.mxu1 %v358_v37 }
  0x2b   : > { %557 = vmatpush.msra.mxu2 %v346_v36  ;;  %2111 = vmatmul.msk.f32.vlgmr.msrb.gmra.mxu1 %vm418_vm0, %v2547_v13 }
  0x2c   : > { %2108 = vmatmul.msk.f32.vlgmr.msra.gmra.mxu2 %vm418_vm0, %v2547_v13  ;;  %596 = vmatpush.msra.mxu0 %v355_v39 }
  0x2d   : > { %654 = vmatpush.msra.mxu3 %v369_v41  ;;  %634 = vmatpush.msrb.mxu2 %v365_v43 }
  0x2e   : > { %597 = vmatpush.msra.mxu0 %v354_v40 }
  0x2f   : > { %2110 = vmatmul.msk.f32.vlgmr.msra.gmra.mxu0 %vm418_vm0, %v2547_v13  ;;  %655 = vmatpush.msra.mxu3 %v368_v42 }
  0x30   : > { %635 = vmatpush.msrb.mxu2 %v364_v45 }
  0x31   : > { %656 = vmatpush.msra.mxu3 %v367_v44 }
  0x32   : > { %636 = vmatpush.msrb.mxu2 %v363_v47 }
  0x33   : > { %657 = vmatpush.msra.mxu3 %v366_v46 }
  0x34   : > { %2113 = vmatmul.msk.f32.vlgmr.msra.gmra.mxu3 %vm418_vm0, %v2547_v13  ;;  %637 = vmatpush.msrb.mxu2 %v362_v48 }
  0x35   : > { %2112 = vmatmul.msk.f32.vlgmr.msrb.gmra.mxu2 %vm418_vm0, %v2547_v13 }
  0x98   : > { %v439_v49 = vpop.f32.mrf.mxu0 }
  0x99   : > { %v440_v60 = vadd.f32 %v2272_v56, %v439_v49 }
  0x9c   : > { %v539_v52 = vpop.f32.mrf.mxu1 }
  0x9d   : > { %v540_v53 = vadd.f32 %v2273_v50, %v539_v52 }
  0x9f   : > { %v459_v54 = vpop.f32.mrf.mxu2  ;;  %2116 = vmatpush.xpose.msk.msra.mxu1 %vm662_vm1, %v540_v53 }
  0xa0   : > { %v460_v57 = vadd.f32 %v2274_v51, %v459_v54 }
  0xa1   : > { %v519_v58 = vpop.f32.mrf.mxu0 }
  0xa2   : > { %v520_v59 = vadd.f32 %v2275_v55, %v519_v58  ;;  %2117 = vmatmul.msk.f32.vlgmr.msra.gmra.mxu1 %vm662_vm1, %v460_v57 }
  0xa4   : > { %v499_v61 = vpop.f32.mrf.mxu3  ;;  %2114 = vmatpush.xpose.msk.msrb.mxu0 %vm662_vm1, %v520_v59 }
  0xa5   : > { %v500_v4 = vadd.f32 %v2276_v0, %v499_v61 }
  0xa7   : > { %v479_v62 = vpop.f32.mrf.mxu2  ;;  %2115 = vmatmul.msk.f32.vlgmr.msrb.gmra.mxu0 %vm662_vm1, %v440_v60 }
  0xa8   : > { %v480_v8 = vadd.f32 %v2277_v5, %v479_v62  ;;  %v619_v10 = vpop.f32.mrf.mxu1 }
  0xa9   : > { %v620_v11 = vadd.f32 %v2280_v9, %v619_v10 }
  0xab   : > { %904 = vmatpush.msrb.mxu1 %v620_v11 }
  0xac   : > { %v599_v14 = vpop.f32.mrf.mxu0 }
  0xad   : > { %v579_v1 = vpop.f32.mrf.mxu3  ;;  %v600_v15 = vadd.f32 %v2281_v12, %v599_v14 }
  0xae   : > { %v580_v3 = vadd.f32 %v2278_v63, %v579_v1 }
  0xaf   : > { %v559_v6 = vpop.f32.mrf.mxu2  ;;  %881 = vmatpush.msra.mxu0 %v600_v15 }
  0xb0   : > { %2120 = vmatpush.xpose.msk.msrb.mxu3 %vm662_vm1, %v580_v3  ;;  %v560_v7 = vadd.f32 %v2279_v2, %v559_v6 }
  0xb2   : > { %2118 = vmatpush.xpose.msk.msra.mxu2 %vm662_vm1, %v560_v7 }
  0xb3   : > { %2121 = vmatmul.msk.f32.vlgmr.msrb.gmra.mxu3 %vm662_vm1, %v500_v4 }
  0xb5   : > { %2119 = vmatmul.msk.f32.vlgmr.msra.gmra.mxu2 %vm662_vm1, %v480_v8 }
  0xb7   : > { %v659_v17 = vpop.f32.mrf.mxu3 }
  0xb8   : > { %v660_v18 = vadd.f32 %v2282_v16, %v659_v17  ;;  %v639_v20 = vpop.f32.mrf.mxu2 }
  0xb9   : > { %v640_v21 = vadd.f32 %v2283_v19, %v639_v20 }
  0xba   : > { %950 = vmatpush.msra.mxu3 %v660_v18 }
  0xbb   : > { %927 = vmatpush.msrb.mxu2 %v640_v21 }
 0x11f   : > { %v712_v24 = vpop.f32.mrf.mxu1 }
 0x120   : > { %v770_v25 = vsel %vm662_vm1, %v712_v24, -inf }
 0x124   : > { %v686_v22 = vpop.f32.mrf.mxu0 }
 0x125   : > { %v767_v23 = vsel %vm662_vm1, %v686_v22, -inf }
 0x126   : > { %768 = vmax.xlane.f32.xlu1 %v767_v23 }
 0x12e   : > { %771 = vmax.xlane.f32.xlu1 %v770_v25 }
 0x136   : > { %v764_v28 = vpop.f32.mrf.mxu3 }
 0x137   : > { %v776_v29 = vsel %vm662_vm1, %v764_v28, -inf }
 0x138   : > { %v738_v26 = vpop.f32.mrf.mxu2 }
 0x139   : > { %v773_v27 = vsel %vm662_vm1, %v738_v26, -inf }
 0x13a   : > { %774 = vmax.xlane.f32.xlu0 %v773_v27 }
 0x142   : > { %777 = vmax.xlane.f32.xlu0 %v776_v29 }
 0x199   : > { %v769_v30 = vpop.xlane.xlu1 %768 }
 0x19a   : > { %v779_v31 = vsub.f32 %v686_v22, %v769_v30 }
 0x19c   : > { %v783_v32 = vmul.f32 1.442695, %v779_v31 }
 0x19e   : > { %2296 = vpow2.f32 %v783_v32 }
 0x1a1   : > { %v772_v33 = vpop.xlane.xlu1 %771 }
 0x1a2   : > { %v780_v34 = vsub.f32 %v712_v24, %v772_v33 }
 0x1a4   : > { %v2297_v35 = vpop.eup %2296  ;;  %v785_v36 = vmul.f32 1.442695, %v780_v34 }
 0x1a5   : > { %v791_v37 = vsel %vm662_vm1, %v2297_v35, 0.0 }
 0x1a6   : > { %2298 = vpow2.f32 %v785_v36  ;;  %792 = vadd.xlane.f32.xlu0 %v791_v37  ;;  %v956_v36 = vld [vmem:[%s3132_s4 + $0x8] sm:$0xff]  ;;  %v957_v37 = vld [vmem:[%s3132_s4 + $0x10] sm:$0xff] }
 0x1a7   : > { %1000 = vmatpush.msra.mxu1 %v956_v36  ;;  %1023 = vmatpush.msra.mxu2 %v957_v37  ;;  %v2167_v36 = vld [vmem:[%s3130_s2 + $0x268] sm:$0xff]  ;;  %v2154_v37 = vld [vmem:[%s3130_s2 + $0x200] sm:$0xff] }
 0x1ac   : > { %v2299_v38 = vpop.eup %2298 }
 0x1ad   : > { %v775_v39 = vpop.xlane.xlu0 %774  ;;  %v794_v40 = vsel %vm662_vm1, %v2299_v38, 0.0 }
 0x1ae   : > { %v781_v41 = vsub.f32 %v738_v26, %v775_v39  ;;  %795 = vadd.xlane.f32.xlu1 %v794_v40 }
 0x1b0   : > { %v787_v42 = vmul.f32 1.442695, %v781_v41 }
 0x1b2   : > { %2300 = vpow2.f32 %v787_v42 }
 0x1b5   : > { %v778_v43 = vpop.xlane.xlu0 %777 }
 0x1b6   : > { %v782_v44 = vsub.f32 %v764_v28, %v778_v43 }
 0x1b8   : > { %v2728_v45 = vpop.eup %2300  ;;  %v789_v46 = vmul.f32 1.442695, %v782_v44 }
 0x1b9   : > { %v797_v47 = vsel %vm662_vm1, %v2728_v45, 0.0 }
 0x1ba   : > { %2302 = vpow2.f32 %v789_v46  ;;  %798 = vadd.xlane.f32.xlu2 %v797_v47 }
 0x1c0   : > { %v2732_v48 = vpop.eup %2302 }
 0x1c1   : > { %v800_v49 = vsel %vm662_vm1, %v2732_v48, 0.0 }
 0x1c2   : > { %801 = vadd.xlane.f32.xlu2 %v800_v49  ;;  %v2764_v49 = vld [vmem:[%s3135_s7] sm:$0xff] }
 0x219   : > { %v793_v50 = vpop.xlane.xlu0 %792 }
 0x21a   : > { %2304 = vrcp.f32 %v793_v50  ;;  %v814_v55 = vand.u32 2147483648, %v793_v50  ;;  %v812_v57 = vand.u32 2147483647, %v793_v50  ;;  %vm808_vm3 = vweird.f32 %v793_v50 }
 0x21c   : > { %v815_v60 = vor.u32 1.1754944e-38, %v814_v55  ;;  %vm813_vm5 = vcmp.eq.f32.partialorder %v812_v57, 8.507059e+37 }
 0x220   : > { %v2305_v51 = vpop.eup %2304 }
 0x221   : > { %v804_v52 = vmul.f32 %v2305_v51, %v793_v50  ;;  %v796_v53 = vpop.xlane.xlu1 %795  ;;  %vm809_vm2 = vweird.f32 %v2305_v51 }
 0x222   : > { %2306 = vrcp.f32 %v796_v53  ;;  %vm810_vm4 = vmor %vm808_vm3, %vm809_vm2  ;;  %v829_v2 = vand.u32 2147483648, %v796_v53  ;;  %v827_v4 = vand.u32 2147483647, %v796_v53  ;;  %vm823_vm7 = vweird.f32 %v796_v53 }
 0x223   : > { %v805_v54 = vsub.f32 1.0, %v804_v52 }
 0x224   : > { %v830_v7 = vor.u32 1.1754944e-38, %v829_v2  ;;  %vm828_vm9 = vcmp.eq.f32.partialorder %v827_v4, 8.507059e+37 }
 0x225   : > { %v806_v56 = vmul.f32 %v2305_v51, %v805_v54 }
 0x227   : > { %v807_v58 = vadd.f32 %v2305_v51, %v806_v56 }
 0x228   : > { %v2307_v59 = vpop.eup %2306 }
 0x229   : > { %v811_v61 = vsel %vm810_vm4, %v2305_v51, %v807_v58  ;;  %v819_v62 = vmul.f32 %v2307_v59, %v796_v53  ;;  %vm824_vm6 = vweird.f32 %v2307_v59  ;;  %v1058_v53 = vperm.slane %v2764_v49, 0 }
 0x22a   : > { %v816_v63 = vsel %vm813_vm5, %v815_v60, %v811_v61  ;;  %vm825_vm8 = vmor %vm823_vm7, %vm824_vm6 }
 0x22b   : > { %v820_v0 = vsub.f32 1.0, %v819_v62  ;;  %v817_v1 = vmul.f32 %v2297_v35, %v816_v63  ;;  %v955_v35 = vld [vmem:[%s3132_s4] sm:$0xff] }
 0x22c   : > { %977 = vmatpush.msrb.mxu0 %v955_v35  ;;  %v2163_v35 = vld [vmem:[%s3130_s2 + $0x248] sm:$0xff] }
 0x22d   : > { %v821_v3 = vmul.f32 %v2307_v59, %v820_v0  ;;  %v799_v5 = vpop.xlane.xlu2 %798  ;;  %2122 = vmatmul.msk.f32.vlgmr.msra.gmra.mxu0 %vm662_vm1, %v817_v1 }
 0x22e   : > { %2308 = vrcp.f32 %v799_v5  ;;  %v844_v16 = vand.u32 2147483648, %v799_v5  ;;  %v842_v18 = vand.u32 2147483647, %v799_v5  ;;  %vm838_vm11 = vweird.f32 %v799_v5 }
 0x22f   : > { %v822_v6 = vadd.f32 %v2307_v59, %v821_v3 }
 0x230   : > { %v845_v21 = vor.u32 1.1754944e-38, %v844_v16  ;;  %vm843_vm13 = vcmp.eq.f32.partialorder %v842_v18, 8.507059e+37  ;;  %v2135_v16 = vld [vmem:[%s3130_s2 + $0x1a8] sm:$0xff] }
 0x231   : > { %v826_v8 = vsel %vm825_vm8, %v2307_v59, %v822_v6  ;;  %v2404_v59 = vmov 32.0   ;;  %v2133_v6 = vld [vmem:[%s3130_s2 + $0x198] sm:$0xff]  ;;  %v2143_v18 = vld [vmem:[%s3130_s2 + $0x1e8] sm:$0xff]  ;;  %vm1644_vm8 = vcmask 1045504  }
 0x232   : > { %v831_v9 = vsel %vm828_vm9, %v830_v7, %v826_v8  ;;  %v2137_v7 = vld [vmem:[%s3130_s2 + $0x1b8] sm:$0xff]  ;;  %1143 = vmatpush.msra.mxu0 %v2133_v6  ;;  %v2178_v6 = vld [vmem:[%s3130_s2 + $0x2c0] sm:$0xff]  ;;  %vm1544_vm9 = vcmask 48128  }
 0x233   : > { %v832_v10 = vmul.f32 %v2299_v38, %v831_v9  ;;  %v958_v38 = vld [vmem:[%s3132_s4 + $0x18] sm:$0xff] }
 0x234   : > { %v2309_v11 = vpop.eup %2308  ;;  %1046 = vmatpush.msrb.mxu3 %v958_v38  ;;  %v2141_v8 = vld [vmem:[%s3130_s2 + $0x1d8] sm:$0xff]  ;;  %v2158_v38 = vld [vmem:[%s3130_s2 + $0x220] sm:$0xff] }
 0x235   : > { %v834_v12 = vmul.f32 %v2309_v11, %v799_v5  ;;  %v802_v14 = vpop.xlane.xlu2 %801  ;;  %2123 = vmatmul.msk.f32.vlgmr.msrb.gmra.mxu1 %vm662_vm1, %v832_v10  ;;  %vm839_vm10 = vweird.f32 %v2309_v11  ;;  %v2145_v9 = vld [vmem:[%s3130_s2 + $0x1f8] sm:$0xff]  ;;  %v2132_v10 = vld [vmem:[%s3130_s2 + $0x190] sm:$0xff] }
 0x236   : > { %2310 = vrcp.f32 %v802_v14  ;;  %vm840_vm12 = vmor %vm838_vm11, %vm839_vm10  ;;  %v859_v27 = vand.u32 2147483648, %v802_v14  ;;  %v857_v29 = vand.u32 2147483647, %v802_v14  ;;  %vm853_vm15 = vweird.f32 %v802_v14  ;;  %1163 = vmatpush.msrb.mxu1 %v2137_v7  ;;  %1144 = vmatpush.msra.mxu0 %v2132_v10  ;;  %v2182_v7 = vld [vmem:[%s3130_s2 + $0x2e0] sm:$0xff]  ;;  %v2288_v10 = vld [vmem:[%s3131_s3 + $0x10] ss:$0 sm:$0xff] }
 0x237   : > { %v835_v15 = vsub.f32 1.0, %v834_v12  ;;  %2312 = vrcp.f32 %v2404_v59  ;;  %v2140_v12 = vld [vmem:[%s3130_s2 + $0x1d0] sm:$0xff] }
 0x238   : > { %v860_v31 = vor.u32 1.1754944e-38, %v859_v27  ;;  %vm858_vm3 = vcmp.eq.f32.partialorder %v857_v29, 8.507059e+37  ;;  %v2156_v27 = vld [vmem:[%s3130_s2 + $0x210] sm:$0xff] }
 0x239   : > { %v836_v17 = vmul.f32 %v2309_v11, %v835_v15  ;;  %v2131_v15 = vld [vmem:[%s3130_s2 + $0x188] sm:$0xff]  ;;  %v2176_v59 = vld [vmem:[%s3130_s2 + $0x2b0] sm:$0xff] }
 0x23a   : > { %1145 = vmatpush.msra.mxu0 %v2131_v15  ;;  %v2284_v15 = vld [vmem:[%s3131_s3 + $0xc] ss:$0 sm:$0xff] }
 0x23b   : > { %v837_v19 = vadd.f32 %v2309_v11, %v836_v17  ;;  %v2139_v17 = vld [vmem:[%s3130_s2 + $0x1c8] sm:$0xff] }
 0x23c   : > { %v2311_v20 = vpop.eup %2310 }
 0x23d   : > { %v841_v22 = vsel %vm840_vm12, %v2309_v11, %v837_v19  ;;  %v849_v23 = vmul.f32 %v2311_v20, %v802_v14  ;;  %vm854_vm14 = vweird.f32 %v2311_v20  ;;  %v2313_v60 = vpop.eup %2312  ;;  %v2136_v11 = vld [vmem:[%s3130_s2 + $0x1b0] sm:$0xff]  ;;  %v2130_v19 = vld [vmem:[%s3130_s2 + $0x180] sm:$0xff] }
 0x23e   : > { %v846_v24 = vsel %vm843_vm13, %v845_v21, %v841_v22  ;;  %vm855_vm2 = vmor %vm853_vm15, %vm854_vm14  ;;  %v1065_v61 = vmul.f32 32.0, %v2313_v60  ;;  %vm1069_vm4 = vweird.f32 %v2313_v60  ;;  %1164 = vmatpush.msrb.mxu1 %v2136_v11  ;;  %v2144_v14 = vld [vmem:[%s3130_s2 + $0x1f0] sm:$0xff]  ;;  %v2138_v21 = vld [vmem:[%s3130_s2 + $0x1c0] sm:$0xff]  ;;  %1146 = vmatpush.msra.mxu0 %v2130_v19 }
 0x23f   : > { %v850_v25 = vsub.f32 1.0, %v849_v23  ;;  %v847_v26 = vmul.f32 %v2728_v45, %v846_v24  ;;  %v2142_v22 = vld [vmem:[%s3130_s2 + $0x1e0] sm:$0xff]  ;;  %v2157_v23 = vld [vmem:[%s3130_s2 + $0x218] sm:$0xff]  ;;  %v2289_v11 = vld [vmem:[%s3131_s3 + $0x11] ss:$0 sm:$0xff] }
 0x240   : > { %v1066_v62 = vsub.f32 1.0, %v1065_v61  ;;  %1165 = vmatpush.msrb.mxu1 %v2135_v16  ;;  %v2161_v24 = vld [vmem:[%s3130_s2 + $0x238] sm:$0xff]  ;;  %v2175_v61 = vld [vmem:[%s3130_s2 + $0x2a8] sm:$0xff] }
 0x241   : > { %v851_v28 = vmul.f32 %v2311_v20, %v850_v25  ;;  %2124 = vmatmul.msk.f32.vlgmr.msrb.gmra.mxu2 %vm662_vm1, %v847_v26  ;;  %v2165_v25 = vld [vmem:[%s3130_s2 + $0x258] sm:$0xff]  ;;  %v2285_v16 = vld [vmem:[%s3131_s3 + $0xd] ss:$0 sm:$0xff] }
 0x242   : > { %v1067_v63 = vmul.f32 %v2313_v60, %v1066_v62  ;;  %1183 = vmatpush.msrb.mxu2 %v2141_v8  ;;  %v2169_v26 = vld [vmem:[%s3130_s2 + $0x278] sm:$0xff]  ;;  %v2170_v62 = vld [vmem:[%s3130_s2 + $0x280] sm:$0xff] }
 0x243   : > { %v852_v30 = vadd.f32 %v2311_v20, %v851_v28  ;;  %v2160_v28 = vld [vmem:[%s3130_s2 + $0x230] sm:$0xff] }
 0x244   : > { %v1068_v0 = vadd.f32 %v2313_v60, %v1067_v63  ;;  %1184 = vmatpush.msrb.mxu2 %v2140_v12  ;;  %v2174_v63 = vld [vmem:[%s3130_s2 + $0x2a0] sm:$0xff] }
 0x245   : > { %v856_v32 = vsel %vm855_vm2, %v2311_v20, %v852_v30  ;;  %v2134_v20 = vld [vmem:[%s3130_s2 + $0x1a0] sm:$0xff]  ;;  %v2164_v30 = vld [vmem:[%s3130_s2 + $0x250] sm:$0xff] }
 0x246   : > { %v861_v33 = vsel %vm858_vm3, %v860_v31, %v856_v32  ;;  %v2770_v1 = vsel %vm1069_vm4, %v2313_v60, %v1068_v0  ;;  %1185 = vmatpush.msrb.mxu2 %v2139_v17  ;;  %1166 = vmatpush.msrb.mxu1 %v2134_v20  ;;  %v2168_v31 = vld [vmem:[%s3130_s2 + $0x270] sm:$0xff]  ;;  %v2155_v32 = vld [vmem:[%s3130_s2 + $0x208] sm:$0xff]  ;;  %v2181_v0 = vld [vmem:[%s3130_s2 + $0x2d8] sm:$0xff] }
 0x247   : > { %v862_v34 = vmul.f32 %v2732_v48, %v861_v33  ;;  %v2171_v60 = vld [vmem:[%s3130_s2 + $0x288] sm:$0xff] }
 0x248   : > { %1186 = vmatpush.msrb.mxu2 %v2138_v21 }
 0x249   : > { %2125 = vmatmul.msk.f32.vlgmr.msra.gmra.mxu3 %vm662_vm1, %v862_v34  ;;  %v2159_v34 = vld [vmem:[%s3130_s2 + $0x228] sm:$0xff] }
 0x24a   : > { %1203 = vmatpush.msra.mxu3 %v2145_v9 }
 0x24c   : > { %1204 = vmatpush.msra.mxu3 %v2144_v14 }
 0x24e   : > { %1205 = vmatpush.msra.mxu3 %v2143_v18 }
 0x250   : > { %1206 = vmatpush.msra.mxu3 %v2142_v22 }
 0x2aa   : > { %v883_v39 = vpop.f32.mrf.mxu0 }
 0x2ab   : > { %2126 = vmatmul.msk.f32.vlgmr.msrb.gmra.mxu0 %vm662_vm1, %v883_v39 }
 0x2ac   : > { %1292 = vmatpush.msrb.mxu0 %v2157_v23  ;;  %v2290_v23 = vld [vmem:[%s3131_s3 + $0x12] ss:$0 sm:$0xff] }
 0x2ae   : > { %1293 = vmatpush.msrb.mxu0 %v2156_v27 }
 0x2b0   : > { %1294 = vmatpush.msrb.mxu0 %v2155_v32 }
 0x2b2   : > { %v906_v40 = vpop.f32.mrf.mxu1  ;;  %1295 = vmatpush.msrb.mxu0 %v2154_v37 }
 0x2b3   : > { %2127 = vmatmul.msk.f32.vlgmr.msra.gmra.mxu1 %vm662_vm1, %v906_v40  ;;  %v2162_v40 = vld [vmem:[%s3130_s2 + $0x240] sm:$0xff] }
 0x2b4   : > { %1312 = vmatpush.msra.mxu1 %v2161_v24  ;;  %v2291_v24 = vld [vmem:[%s3131_s3 + $0x13] ss:$0 sm:$0xff] }
 0x2b6   : > { %1313 = vmatpush.msra.mxu1 %v2160_v28 }
 0x2b8   : > { %1314 = vmatpush.msra.mxu1 %v2159_v34  ;;  %v2293_v34 = vld [vmem:[%s3131_s3 + $0x15] ss:$0 sm:$0xff] }
 0x2ba   : > { %1315 = vmatpush.msra.mxu1 %v2158_v38 }
 0x2c4   : > { %v929_v41 = vpop.f32.mrf.mxu2 }
 0x2c5   : > { %2128 = vmatmul.msk.f32.vlgmr.msra.gmra.mxu2 %vm662_vm1, %v929_v41  ;;  %v2166_v41 = vld [vmem:[%s3130_s2 + $0x260] sm:$0xff] }
 0x2c6   : > { %1332 = vmatpush.msra.mxu2 %v2165_v25  ;;  %v2286_v25 = vld [vmem:[%s3131_s3 + $0xe] ss:$0 sm:$0xff] }
 0x2c8   : > { %1333 = vmatpush.msra.mxu2 %v2164_v30 }
 0x2ca   : > { %1334 = vmatpush.msra.mxu2 %v2163_v35  ;;  %v2294_v35 = vld [vmem:[%s3131_s3 + $0x16] ss:$0 sm:$0xff] }
 0x2cc   : > { %v952_v42 = vpop.f32.mrf.mxu3  ;;  %1335 = vmatpush.msra.mxu2 %v2162_v40 }
 0x2cd   : > { %2129 = vmatmul.msk.f32.vlgmr.msrb.gmra.mxu3 %vm662_vm1, %v952_v42 }
 0x2ce   : > { %1352 = vmatpush.msrb.mxu3 %v2169_v26  ;;  %v2287_v26 = vld [vmem:[%s3131_s3 + $0xf] ss:$0 sm:$0xff] }
 0x2d0   : > { %1353 = vmatpush.msrb.mxu3 %v2168_v31 }
 0x2d2   : > { %1354 = vmatpush.msrb.mxu3 %v2167_v36  ;;  %v2295_v36 = vld [vmem:[%s3131_s3 + $0x17] ss:$0 sm:$0xff] }
 0x2d4   : > { %1355 = vmatpush.msrb.mxu3 %v2166_v41 }
 0x328   : > { %v979_v44 = vpop.f32.mrf.mxu0 }
 0x329   : > { %v1051_v47 = vsel %vm418_vm0, %v979_v44, 0.0 }
 0x330   : > { %v1002_v43 = vpop.f32.mrf.mxu1 }
 0x331   : > { %v1052_v46 = vsel %vm418_vm0, %v1002_v43, 0.0 }
 0x332   : > { %v1053_v50 = vadd.f32 %v1052_v46, %v1051_v47 }
 0x348   : > { %v1025_v45 = vpop.f32.mrf.mxu2 }
 0x349   : > { %v1054_v48 = vsel %vm418_vm0, %v1025_v45, 0.0 }
 0x34a   : > { %v1055_v51 = vadd.f32 %v1054_v48, %v1053_v50  ;;  %v1090_v48 = vperm.slane %v2764_v49, 4 }
 0x350   : > { %v1048_v52 = vpop.f32.mrf.mxu3 }
 0x351   : > { %v1056_v54 = vsel %vm418_vm0, %v1048_v52, 0.0  ;;  %v1092_v52 = vperm.slane %v2764_v49, 5 }
 0x352   : > { %v1057_v55 = vadd.f32 %v1056_v54, %v1055_v51 }
 0x354   : > { %v1059_v56 = vadd.f32 %v1058_v53, %v1057_v55  ;;  %v2173_v55 = vld [vmem:[%s3130_s2 + $0x298] sm:$0xff] }
 0x356   : > { %v1060_v57 = vadd.f32 %v1059_v56, %v2547_v13  ;;  %v2177_v56 = vld [vmem:[%s3130_s2 + $0x2b8] sm:$0xff] }
 0x358   : > { %v1061_v58 = vsel %vm418_vm0, %v1060_v57, 0.0 }
 0x359   : > { %1062 = vadd.xlane.f32.xlu2 %v1061_v58  ;;  %v2172_v58 = vld [vmem:[%s3130_s2 + $0x290] sm:$0xff] }
 0x3cc   : > { %v1063_v2 = vpop.xlane.xlu2 %1062 }
 0x3cd   : > { %v1071_v3 = vmul.f32 %v2770_v1, %v1063_v2  ;;  %v2185_v2 = vld [vmem:[%s3130_s2 + $0x2f8] sm:$0xff] }
 0x3cf   : > { %v2773_v4 = vsub.f32 %v1060_v57, %v1071_v3  ;;  %v319_v57 = vld [vmem:[%s317_s20] sm:$0x3f]  ;;  %v2180_v3 = vld [vmem:[%s3130_s2 + $0x2d0] sm:$0xff] }
 0x3d1   : > { %v1073_v13 = vmul.f32 %v2773_v4, %v2773_v4 }
 0x3d3   : > { %v1074_v5 = vsel %vm418_vm0, %v1073_v13, 0.0  ;;  %v2179_v13 = vld [vmem:[%s3130_s2 + $0x2c8] sm:$0xff] }
 0x3d4   : > { %1075 = vadd.xlane.f32.xlu0 %v1074_v5  ;;  %v2183_v5 = vld [vmem:[%s3130_s2 + $0x2e8] sm:$0xff] }
 0x447   : > { %v1076_v29 = vpop.xlane.xlu0 %1075 }
 0x448   : > { %v1077_v33 = vmul.f32 %v1076_v29, %v2770_v1 }
 0x44a   : > { %v1078_v39 = vadd.f32 1e-05, %v1077_v33  ;;  %v2292_v33 = vld [vmem:[%s3131_s3 + $0x14] ss:$0 sm:$0xff] }
 0x44c   : > { %2314 = vrsqrt.f32 %v1078_v39  ;;  %vm1085_vm6 = vweird.f32 %v1078_v39 }
 0x452   : > { %v2315_v42 = vpop.eup %2314 }
 0x453   : > { %v1080_v43 = vmul.f32 %v2315_v42, %v1078_v39  ;;  %vm1086_vm5 = vweird.f32 %v2315_v42 }
 0x454   : > { %vm1087_vm7 = vmor %vm1085_vm6, %vm1086_vm5 }
 0x455   : > { %v1081_v44 = vmul.f32 %v2315_v42, %v1080_v43 }
 0x457   : > { %v1082_v45 = vmul.f32 0.5, %v1081_v44 }
 0x459   : > { %v1083_v46 = vsub.f32 1.5, %v1082_v45 }
 0x45b   : > { %v1084_v47 = vmul.f32 %v2315_v42, %v1083_v46 }
 0x45d   : > { %v1088_v50 = vsel %vm1087_vm7, %v2315_v42, %v1084_v47 }
 0x45e   : > { %v1089_v51 = vmul.f32 %v1088_v50, %v2773_v4  ;;  %v2184_v4 = vld [vmem:[%s3130_s2 + $0x2f0] sm:$0xff] }
 0x460   : > { %v1091_v53 = vmul.f32 %v1090_v48, %v1089_v51 }
 0x462   : > { %v2878_v54 = vadd.f32 %v1092_v52, %v1091_v53 }
 0x464   : > { %2150 = vmatmul.msk.f32.vlgmr.msra.gmra.mxu0 %vm418_vm0, %v2878_v54  ;;  %2151 = vmatmul.msk.f32.vlgmr.msrb.gmra.mxu1 %vm418_vm0, %v2878_v54 }
 0x465   : > { %2152 = vmatmul.msk.f32.vlgmr.msrb.gmra.mxu2 %vm418_vm0, %v2878_v54  ;;  %2153 = vmatmul.msk.f32.vlgmr.msra.gmra.mxu3 %vm418_vm0, %v2878_v54 }
 0x466   : > { %1372 = vmatpush.msra.mxu0 %v2173_v55  ;;  %1392 = vmatpush.msrb.mxu1 %v2177_v56 }
 0x467   : > { %1412 = vmatpush.msrb.mxu2 %v2181_v0  ;;  %1432 = vmatpush.msra.mxu3 %v2185_v2 }
 0x468   : > { %1373 = vmatpush.msra.mxu0 %v2172_v58  ;;  %1393 = vmatpush.msrb.mxu1 %v2176_v59 }
 0x469   : > { %1413 = vmatpush.msrb.mxu2 %v2180_v3  ;;  %1433 = vmatpush.msra.mxu3 %v2184_v4 }
 0x46a   : > { %1374 = vmatpush.msra.mxu0 %v2171_v60  ;;  %1394 = vmatpush.msrb.mxu1 %v2175_v61 }
 0x46b   : > { %1414 = vmatpush.msrb.mxu2 %v2179_v13  ;;  %1434 = vmatpush.msra.mxu3 %v2183_v5 }
 0x46c   : > { %2194 = vmatmul.msk.f32.vlgmr.msrb.gmra.mxu0 %vm418_vm0, %v319_v57  ;;  %2195 = vmatmul.msk.f32.vlgmr.msra.gmra.mxu1 %vm418_vm0, %v319_v57 }
 0x46d   : > { %2196 = vmatmul.msk.f32.vlgmr.msra.gmra.mxu2 %vm418_vm0, %v319_v57  ;;  %2197 = vmatmul.msk.f32.vlgmr.msrb.gmra.mxu3 %vm418_vm0, %v319_v57 }
 0x46e   : > { %1375 = vmatpush.msra.mxu0 %v2170_v62  ;;  %1395 = vmatpush.msrb.mxu1 %v2174_v63 }
 0x46f   : > { %1415 = vmatpush.msrb.mxu2 %v2178_v6  ;;  %1435 = vmatpush.msra.mxu3 %v2182_v7 }
 0x474   : > { %2198 = vmatmul.msk.f32.vlgmr.msra.gmra.mxu0 %vm418_vm0, %v319_v57  ;;  %2199 = vmatmul.msk.f32.vlgmr.msrb.gmra.mxu1 %vm418_vm0, %v319_v57 }
 0x475   : > { %2200 = vmatmul.msk.f32.vlgmr.msrb.gmra.mxu2 %vm418_vm0, %v319_v57  ;;  %2201 = vmatmul.msk.f32.vlgmr.msra.gmra.mxu3 %vm418_vm0, %v319_v57 }
 0x4e1   : > { %v1148_v8 = vpop.f32.mrf.mxu0  ;;  %v1168_v9 = vpop.f32.mrf.mxu1 }
 0x4e2   : > { %v1149_v21 = vadd.f32 %v2284_v15, %v1148_v8  ;;  %v1169_v22 = vadd.f32 %v2285_v16, %v1168_v9 }
 0x4e8   : > { %v1188_v12 = vpop.f32.mrf.mxu2  ;;  %v1208_v14 = vpop.f32.mrf.mxu3 }
 0x4e9   : > { %v1297_v17 = vpop.f32.mrf.mxu0  ;;  %v1317_v18 = vpop.f32.mrf.mxu1  ;;  %v1189_v31 = vadd.f32 %v2286_v25, %v1188_v12  ;;  %v1209_v32 = vadd.f32 %v2287_v26, %v1208_v14 }
 0x4ea   : > { %v1298_v19 = vadd.f32 %v2288_v10, %v1297_v17  ;;  %v1318_v20 = vadd.f32 %v2289_v11, %v1317_v18 }
 0x4ec   : > { %2202 = vmatpush.xpose.msk.msrb.mxu0 %vm662_vm1, %v1298_v19  ;;  %2204 = vmatpush.xpose.msk.msra.mxu1 %vm662_vm1, %v1318_v20 }
 0x4ef   : > { %2203 = vmatmul.msk.f32.vlgmr.msrb.gmra.mxu0 %vm662_vm1, %v1149_v21  ;;  %2205 = vmatmul.msk.f32.vlgmr.msra.gmra.mxu1 %vm662_vm1, %v1169_v22 }
 0x4f0   : > { %v1337_v27 = vpop.f32.mrf.mxu2  ;;  %v1357_v28 = vpop.f32.mrf.mxu3 }
 0x4f1   : > { %v1338_v29 = vadd.f32 %v2290_v23, %v1337_v27  ;;  %v1358_v30 = vadd.f32 %v2291_v24, %v1357_v28  ;;  %v1377_v37 = vpop.f32.mrf.mxu0  ;;  %v1397_v38 = vpop.f32.mrf.mxu1 }
 0x4f2   : > { %v1378_v39 = vadd.f32 %v2292_v33, %v1377_v37  ;;  %v1398_v40 = vadd.f32 %v2293_v34, %v1397_v38 }
 0x4f3   : > { %2206 = vmatpush.xpose.msk.msra.mxu2 %vm662_vm1, %v1338_v29  ;;  %2208 = vmatpush.xpose.msk.msrb.mxu3 %vm662_vm1, %v1358_v30 }
 0x4f4   : > { %2212 = vmatpush.msk.msrb.mxu1 %vm1644_vm8, %v1398_v40  ;;  %2210 = vmatpush.msk.msra.mxu0 %vm1644_vm8, %v1378_v39 }
 0x4f6   : > { %2207 = vmatmul.msk.f32.vlgmr.msra.gmra.mxu2 %vm662_vm1, %v1189_v31  ;;  %2209 = vmatmul.msk.f32.vlgmr.msrb.gmra.mxu3 %vm662_vm1, %v1209_v32 }
 0x4f8   : > { %v1417_v41 = vpop.f32.mrf.mxu2  ;;  %v1437_v42 = vpop.f32.mrf.mxu3 }
 0x4f9   : > { %v1418_v43 = vadd.f32 %v2294_v35, %v1417_v41  ;;  %v1438_v44 = vadd.f32 %v2295_v36, %v1437_v42 }
 0x4fb   : > { %2214 = vmatpush.msk.msrb.mxu2 %vm1644_vm8, %v1418_v43  ;;  %2216 = vmatpush.msk.msra.mxu3 %vm1644_vm8, %v1438_v44 }
 0x56c   : > { %v1463_v45 = vpop.f32.mrf.mxu0  ;;  %v1489_v52 = vpop.f32.mrf.mxu1 }
 0x56d   : > { %v1545_v46 = vsel %vm1544_vm9, %v1463_v45, -inf  ;;  %v1548_v53 = vsel %vm1544_vm9, %v1489_v52, -inf }
 0x56e   : > { %1546 = vmax.xlane.f32.xlu0 %v1545_v46 }
 0x579   : > { %v1515_v47 = vpop.f32.mrf.mxu2  ;;  %v1541_v48 = vpop.f32.mrf.mxu3 }
 0x57a   : > { %v1554_v50 = vsel %vm1544_vm9, %v1541_v48, -inf  ;;  %v1551_v51 = vsel %vm1544_vm9, %v1515_v47, -inf }
 0x57b   : > { %1555 = vmax.xlane.f32.xlu2 %v1554_v50  ;;  %1552 = vmax.xlane.f32.xlu1 %v1551_v51 }
 0x583   : > { %1549 = vmax.xlane.f32.xlu1 %v1548_v53 }
 0x5e1   : > { %v1547_v55 = vpop.xlane.xlu0 %1546 }
 0x5e2   : > { %v1557_v56 = vsub.f32 %v1463_v45, %v1547_v55 }
 0x5e4   : > { %v1561_v57 = vmul.f32 1.442695, %v1557_v56 }
 0x5e6   : > { %2316 = vpow2.f32 %v1561_v57 }
 0x5ec   : > { %v2317_v58 = vpop.eup %2316 }
 0x5ed   : > { %v1569_v59 = vsel %vm1544_vm9, %v2317_v58, 0.0 }
 0x5ee   : > { %v1556_v60 = vpop.xlane.xlu2 %1555  ;;  %v1553_v61 = vpop.xlane.xlu1 %1552  ;;  %1570 = vadd.xlane.f32.xlu1 %v1569_v59 }
 0x5ef   : > { %v1560_v62 = vsub.f32 %v1541_v48, %v1556_v60  ;;  %v1559_v63 = vsub.f32 %v1515_v47, %v1553_v61 }
 0x5f1   : > { %v1567_v0 = vmul.f32 1.442695, %v1560_v62  ;;  %v1565_v2 = vmul.f32 1.442695, %v1559_v63  ;;  %v2218_v62 = vld [vmem:[%s3132_s4 + $0x20] sm:$0xff]  ;;  %v2220_v63 = vld [vmem:[%s3132_s4 + $0x30] sm:$0xff] }
 0x5f2   : > { %1769 = vmatpush.msrb.mxu0 %v2218_v62  ;;  %1815 = vmatpush.msra.mxu2 %v2220_v63  ;;  %v1949_v62 = vld [vmem:[%s3134_s6 + $0x10] sm:$0xff] }
 0x5f3   : > { %2318 = vpow2.f32 %v1567_v0  ;;  %v2221_v0 = vld [vmem:[%s3132_s4 + $0x38] sm:$0xff] }
 0x5f4   : > { %2320 = vpow2.f32 %v1565_v2  ;;  %1838 = vmatpush.msrb.mxu3 %v2221_v0  ;;  %v2219_v2 = vld [vmem:[%s3132_s4 + $0x28] sm:$0xff] }
 0x5f5   : > { %1792 = vmatpush.msra.mxu1 %v2219_v2 }
 0x5f6   : > { %v1550_v3 = vpop.xlane.xlu1 %1549 }
 0x5f7   : > { %v1558_v4 = vsub.f32 %v1489_v52, %v1550_v3 }
 0x5f9   : > { %v2998_v13 = vpop.eup %2318  ;;  %v1563_v5 = vmul.f32 1.442695, %v1558_v4 }
 0x5fa   : > { %v3000_v6 = vpop.eup %2320  ;;  %v1578_v7 = vsel %vm1544_vm9, %v2998_v13, 0.0 }
 0x5fb   : > { %2322 = vpow2.f32 %v1563_v5  ;;  %v1575_v8 = vsel %vm1544_vm9, %v3000_v6, 0.0  ;;  %1579 = vadd.xlane.f32.xlu0 %v1578_v7 }
 0x5fc   : > { %1576 = vadd.xlane.f32.xlu2 %v1575_v8 }
 0x601   : > { %v3006_v9 = vpop.eup %2322 }
 0x602   : > { %v1572_v10 = vsel %vm1544_vm9, %v3006_v9, 0.0 }
 0x604   : > { %1573 = vadd.xlane.f32.xlu2 %v1572_v10 }
 0x661   : > { %v1571_v11 = vpop.xlane.xlu1 %1570 }
 0x662   : > { %2324 = vrcp.f32 %v1571_v11  ;;  %v1592_v16 = vand.u32 2147483648, %v1571_v11  ;;  %v1590_v18 = vand.u32 2147483647, %v1571_v11  ;;  %vm1586_vm11 = vweird.f32 %v1571_v11 }
 0x664   : > { %v1593_v22 = vor.u32 1.1754944e-38, %v1592_v16  ;;  %vm1591_vm13 = vcmp.eq.f32.partialorder %v1590_v18, 8.507059e+37  ;;  %v1850_v16 = vperm.slane %v2764_v49, 1 }
 0x668   : > { %v2325_v12 = vpop.eup %2324 }
 0x669   : > { %v1582_v14 = vmul.f32 %v2325_v12, %v1571_v11  ;;  %vm1587_vm10 = vweird.f32 %v2325_v12 }
 0x66a   : > { %vm1588_vm12 = vmor %vm1586_vm11, %vm1587_vm10 }
 0x66b   : > { %v1583_v15 = vsub.f32 1.0, %v1582_v14 }
 0x66d   : > { %v1584_v17 = vmul.f32 %v2325_v12, %v1583_v15 }
 0x66e   : > { %v1580_v19 = vpop.xlane.xlu0 %1579 }
 0x66f   : > { %v1585_v20 = vadd.f32 %v2325_v12, %v1584_v17  ;;  %v1577_v21 = vpop.xlane.xlu2 %1576  ;;  %2326 = vrcp.f32 %v1580_v19  ;;  %v1637_v33 = vand.u32 2147483648, %v1580_v19  ;;  %v1635_v36 = vand.u32 2147483647, %v1580_v19 }
 0x670   : > { %2328 = vrcp.f32 %v1577_v21  ;;  %v1622_v34 = vand.u32 2147483648, %v1577_v21  ;;  %v1620_v38 = vand.u32 2147483647, %v1577_v21  ;;  %vm1631_vm2 = vweird.f32 %v1580_v19 }
 0x671   : > { %v1589_v23 = vsel %vm1588_vm12, %v2325_v12, %v1585_v20  ;;  %vm1616_vm3 = vweird.f32 %v1577_v21  ;;  %v1638_v41 = vor.u32 1.1754944e-38, %v1637_v33  ;;  %vm1636_vm6 = vcmp.eq.f32.partialorder %v1635_v36, 8.507059e+37 }
 0x672   : > { %v1594_v24 = vsel %vm1591_vm13, %v1593_v22, %v1589_v23  ;;  %v1623_v43 = vor.u32 1.1754944e-38, %v1622_v34  ;;  %vm1621_vm7 = vcmp.eq.f32.partialorder %v1620_v38, 8.507059e+37 }
 0x673   : > { %v1595_v25 = vmul.f32 %v2317_v58, %v1594_v24 }
 0x675   : > { %v2327_v26 = vpop.eup %2326  ;;  %2211 = vmatmul.msk.f32.vlgmr.msra.gmra.mxu0 %vm1544_vm9, %v1595_v25 }
 0x676   : > { %v2329_v27 = vpop.eup %2328  ;;  %v1627_v28 = vmul.f32 %v2327_v26, %v1580_v19  ;;  %vm1632_vm14 = vweird.f32 %v2327_v26 }
 0x677   : > { %v1612_v29 = vmul.f32 %v2329_v27, %v1577_v21  ;;  %v1574_v30 = vpop.xlane.xlu2 %1573  ;;  %vm1617_vm15 = vweird.f32 %v2329_v27  ;;  %vm1633_vm4 = vmor %vm1631_vm2, %vm1632_vm14 }
 0x678   : > { %v1628_v31 = vsub.f32 1.0, %v1627_v28  ;;  %2330 = vrcp.f32 %v1574_v30  ;;  %vm1618_vm5 = vmor %vm1616_vm3, %vm1617_vm15  ;;  %v1607_v53 = vand.u32 2147483648, %v1574_v30  ;;  %v1605_v56 = vand.u32 2147483647, %v1574_v30  ;;  %v1880_v28 = vld [vmem:[%s3133_s5 + $0x8] sm:$0xff] }
 0x679   : > { %v1613_v32 = vsub.f32 1.0, %v1612_v29  ;;  %vm1601_vm10 = vweird.f32 %v1574_v30  ;;  %v1879_v29 = vld [vmem:[%s3133_s5] sm:$0xff] }
 0x67a   : > { %v1629_v35 = vmul.f32 %v2327_v26, %v1628_v31  ;;  %v1608_v58 = vor.u32 1.1754944e-38, %v1607_v53  ;;  %vm1606_vm12 = vcmp.eq.f32.partialorder %v1605_v56, 8.507059e+37  ;;  %v1954_v53 = vld [vmem:[%s3134_s6 + $0x38] sm:$0xff]  ;;  %v1952_v56 = vld [vmem:[%s3134_s6 + $0x28] sm:$0xff] }
 0x67b   : > { %v1614_v37 = vmul.f32 %v2329_v27, %v1613_v32 }
 0x67c   : > { %v1630_v39 = vadd.f32 %v2327_v26, %v1629_v35 }
 0x67d   : > { %v1615_v40 = vadd.f32 %v2329_v27, %v1614_v37 }
 0x67e   : > { %v2331_v42 = vpop.eup %2330  ;;  %v1634_v44 = vsel %vm1633_vm4, %v2327_v26, %v1630_v39  ;;  %v1875_v39 = vperm.slane %v2764_v49, 6 }
 0x67f   : > { %v1619_v45 = vsel %vm1618_vm5, %v2329_v27, %v1615_v40  ;;  %v1639_v46 = vsel %vm1636_vm6, %v1638_v41, %v1634_v44  ;;  %v1597_v47 = vmul.f32 %v2331_v42, %v1574_v30  ;;  %vm1602_vm8 = vweird.f32 %v2331_v42  ;;  %v1882_v27 = vld [vmem:[%s3133_s5 + $0x18] sm:$0xff] }
 0x680   : > { %v1624_v48 = vsel %vm1621_vm7, %v1623_v43, %v1619_v45  ;;  %v1640_v50 = vmul.f32 %v2998_v13, %v1639_v46  ;;  %vm1603_vm11 = vmor %vm1601_vm10, %vm1602_vm8  ;;  %1899 = vmatpush.msra.mxu0 %v1882_v27  ;;  %v1883_v45 = vperm.slane %v2764_v49, 2  ;;  %vm1956_vm5 = vcmask 523264  }
 0x681   : > { %v1598_v51 = vsub.f32 1.0, %v1597_v47  ;;  %v1625_v52 = vmul.f32 %v3000_v6, %v1624_v48 }
 0x682   : > { %2217 = vmatmul.msk.f32.vlgmr.msra.gmra.mxu3 %vm1544_vm9, %v1640_v50 }
 0x683   : > { %v1599_v55 = vmul.f32 %v2331_v42, %v1598_v51  ;;  %2215 = vmatmul.msk.f32.vlgmr.msrb.gmra.mxu2 %vm1544_vm9, %v1625_v52 }
 0x685   : > { %v1600_v57 = vadd.f32 %v2331_v42, %v1599_v55  ;;  %v1953_v55 = vld [vmem:[%s3134_s6 + $0x30] sm:$0xff] }
 0x687   : > { %v1604_v59 = vsel %vm1603_vm11, %v2331_v42, %v1600_v57  ;;  %v1877_v42 = vperm.slane %v2764_v49, 7  ;;  %v1951_v57 = vld [vmem:[%s3134_s6 + $0x20] sm:$0xff] }
 0x688   : > { %v1609_v60 = vsel %vm1606_vm12, %v1608_v58, %v1604_v59 }
 0x689   : > { %v1610_v61 = vmul.f32 %v3006_v9, %v1609_v60  ;;  %v1950_v60 = vld [vmem:[%s3134_s6 + $0x18] sm:$0xff] }
 0x68b   : > { %2213 = vmatmul.msk.f32.vlgmr.msrb.gmra.mxu1 %vm1544_vm9, %v1610_v61 }
 0x68c   : > { %1968 = vmatpush.msrb.mxu1 %v1954_v53 }
 0x68e   : > { %1969 = vmatpush.msrb.mxu1 %v1953_v55 }
 0x690   : > { %1970 = vmatpush.msrb.mxu1 %v1952_v56 }
 0x692   : > { %1971 = vmatpush.msrb.mxu1 %v1951_v57 }
 0x694   : > { %1972 = vmatpush.msrb.mxu1 %v1950_v60 }
 0x696   : > { %1973 = vmatpush.msrb.mxu1 %v1949_v62 }
 0x6f2   : > { %v1665_v3 = vpop.f32.mrf.mxu0 }
 0x6f3   : > { %2222 = vmatmul.msk.f32.vlgmr.msrb.gmra.mxu0 %vm662_vm1, %v1665_v3  ;;  %v1948_v3 = vld [vmem:[%s3134_s6 + $0x8] sm:$0xff] }
 0x6f4   : > { %1974 = vmatpush.msrb.mxu1 %v1948_v3 }
 0x705   : > { %v1743_v4 = vpop.f32.mrf.mxu3 }
 0x706   : > { %v1717_v13 = vpop.f32.mrf.mxu2  ;;  %2225 = vmatmul.msk.f32.vlgmr.msrb.gmra.mxu3 %vm662_vm1, %v1743_v4  ;;  %v1947_v4 = vld [vmem:[%s3134_s6] sm:$0xff] }
 0x707   : > { %2224 = vmatmul.msk.f32.vlgmr.msra.gmra.mxu2 %vm662_vm1, %v1717_v13  ;;  %1975 = vmatpush.msrb.mxu1 %v1947_v4 }
 0x708   : > { %v1691_v5 = vpop.f32.mrf.mxu1 }
 0x709   : > { %2223 = vmatmul.msk.f32.vlgmr.msra.gmra.mxu1 %vm662_vm1, %v1691_v5 }
 0x770   : > { %v1771_v6 = vpop.f32.mrf.mxu0 }
 0x771   : > { %v1843_v9 = vsel %vm418_vm0, %v1771_v6, 0.0 }
 0x786   : > { %v1794_v7 = vpop.f32.mrf.mxu1 }
 0x787   : > { %v1844_v8 = vsel %vm418_vm0, %v1794_v7, 0.0 }
 0x788   : > { %v1845_v10 = vadd.f32 %v1844_v8, %v1843_v9 }
 0x789   : > { %v1840_v12 = vpop.f32.mrf.mxu3 }
 0x78a   : > { %v1817_v11 = vpop.f32.mrf.mxu2  ;;  %v1848_v17 = vsel %vm418_vm0, %v1840_v12, 0.0 }
 0x78b   : > { %v1846_v14 = vsel %vm418_vm0, %v1817_v11, 0.0 }
 0x78c   : > { %v1847_v15 = vadd.f32 %v1846_v14, %v1845_v10 }
 0x78e   : > { %v1849_v18 = vadd.f32 %v1848_v17, %v1847_v15 }
 0x790   : > { %v1851_v19 = vadd.f32 %v1850_v16, %v1849_v18 }
 0x792   : > { %v1852_v20 = vadd.f32 %v1851_v19, %v2878_v54  ;;  %v1881_v54 = vld [vmem:[%s3133_s5 + $0x10] sm:$0xff] }
 0x793   : > { %1900 = vmatpush.msra.mxu0 %v1881_v54 }
 0x794   : > { %v1853_v21 = vsel %vm418_vm0, %v1852_v20, 0.0 }
 0x795   : > { %1854 = vadd.xlane.f32.xlu0 %v1853_v21  ;;  %1901 = vmatpush.msra.mxu0 %v1880_v28  ;;  %v1955_v28 = vperm.slane %v2764_v49, 3 }
 0x797   : > { %1902 = vmatpush.msra.mxu0 %v1879_v29 }
 0x808   : > { %v1855_v22 = vpop.xlane.xlu0 %1854 }
 0x809   : > { %v1856_v23 = vmul.f32 %v1855_v22, %v2770_v1 }
 0x80b   : > { %v1857_v24 = vsub.f32 %v1852_v20, %v1856_v23 }
 0x80d   : > { %v1858_v25 = vmul.f32 %v1857_v24, %v1857_v24 }
 0x80f   : > { %v1859_v26 = vsel %vm418_vm0, %v1858_v25, 0.0 }
 0x810   : > { %1860 = vadd.xlane.f32.xlu1 %v1859_v26 }
 0x883   : > { %v1861_v30 = vpop.xlane.xlu1 %1860 }
 0x884   : > { %v1862_v31 = vmul.f32 %v1861_v30, %v2770_v1 }
 0x886   : > { %v1863_v32 = vadd.f32 1e-05, %v1862_v31 }
 0x888   : > { %2332 = vrsqrt.f32 %v1863_v32  ;;  %vm1870_vm9 = vweird.f32 %v1863_v32 }
 0x88e   : > { %v2333_v33 = vpop.eup %2332 }
 0x88f   : > { %v1865_v34 = vmul.f32 %v2333_v33, %v1863_v32  ;;  %vm1871_vm1 = vweird.f32 %v2333_v33 }
 0x890   : > { %vm1872_vm13 = vmor %vm1870_vm9, %vm1871_vm1 }
 0x891   : > { %v1866_v35 = vmul.f32 %v2333_v33, %v1865_v34 }
 0x893   : > { %v1867_v36 = vmul.f32 0.5, %v1866_v35 }
 0x895   : > { %v1868_v37 = vsub.f32 1.5, %v1867_v36 }
 0x897   : > { %v1869_v38 = vmul.f32 %v2333_v33, %v1868_v37 }
 0x899   : > { %v1873_v40 = vsel %vm1872_vm13, %v2333_v33, %v1869_v38 }
 0x89a   : > { %v1874_v41 = vmul.f32 %v1873_v40, %v1857_v24 }
 0x89c   : > { %v1876_v43 = vmul.f32 %v1875_v39, %v1874_v41 }
 0x89e   : > { %v3057_v44 = vadd.f32 %v1877_v42, %v1876_v43 }
 0x8a0   : > { %2226 = vmatmul.msk.f32.vlgmr.msra.gmra.mxu0 %vm418_vm0, %v3057_v44 }
 0x91d   : > { %v1904_v46 = vpop.f32.mrf.mxu0 }
 0x91e   : > { %v1905_v47 = vadd.f32 %v1904_v46, %v1883_v45  ;;  %v321_v45 = vld [vmem:[%s3135_s7 + $0x8] sm:$0x3] }
 0x920   : > { %v1908_v48 = vmul.f32 0.70710677, %v1905_v47  ;;  %v1907_v26 = vmul.f32 0.5, %v1905_v47  ;;  %v2003_v47 = vperm.slane %v321_v45, 0 }
 0x922   : > { %v1909_v50 = vand.u32 2147483647, %v1908_v48  ;;  %vm1942_vm4 = vcmp.ge.f32.partialorder %v1908_v48, 0.0 }
 0x924   : > { %v1910_v51 = vmul.f32 0.3275911, %v1909_v50  ;;  %v1936_v8 = vsub.f32 0.0, %v1909_v50 }
 0x926   : > { %v1911_v52 = vadd.f32 1.0, %v1910_v51  ;;  %v1937_v11 = vmul.f32 %v1936_v8, %v1909_v50  ;;  %v2005_v50 = vperm.slane %v321_v45, 1 }
 0x928   : > { %2334 = vrcp.f32 %v1911_v52  ;;  %v1923_v63 = vand.u32 2147483648, %v1911_v52  ;;  %v1921_v2 = vand.u32 2147483647, %v1911_v52  ;;  %vm1917_vm15 = vweird.f32 %v1911_v52 }
 0x929   : > { %v1938_v15 = vmul.f32 1.442695, %v1937_v11 }
 0x92a   : > { %v1924_v5 = vor.u32 1.1754944e-38, %v1923_v63  ;;  %vm1922_vm3 = vcmp.eq.f32.partialorder %v1921_v2, 8.507059e+37 }
 0x92b   : > { %2336 = vpow2.f32 %v1938_v15 }
 0x92e   : > { %v2335_v58 = vpop.eup %2334 }
 0x92f   : > { %v1913_v59 = vmul.f32 %v2335_v58, %v1911_v52  ;;  %vm1918_vm14 = vweird.f32 %v2335_v58 }
 0x930   : > { %vm1919_vm2 = vmor %vm1917_vm15, %vm1918_vm14 }
 0x931   : > { %v1914_v61 = vsub.f32 1.0, %v1913_v59  ;;  %v2337_v21 = vpop.eup %2336 }
 0x933   : > { %v1915_v0 = vmul.f32 %v2335_v58, %v1914_v61 }
 0x935   : > { %v1916_v13 = vadd.f32 %v2335_v58, %v1915_v0 }
 0x937   : > { %v1920_v6 = vsel %vm1919_vm2, %v2335_v58, %v1916_v13 }
 0x938   : > { %v1925_v7 = vsel %vm1922_vm3, %v1924_v5, %v1920_v6 }
 0x939   : > { %v1927_v9 = vmul.f32 1.0614054, %v1925_v7 }
 0x93b   : > { %v1928_v10 = vadd.f32 -1.4531521, %v1927_v9 }
 0x93d   : > { %v1929_v12 = vmul.f32 %v1928_v10, %v1925_v7 }
 0x93f   : > { %v1930_v14 = vadd.f32 1.4214138, %v1929_v12 }
 0x941   : > { %v1931_v16 = vmul.f32 %v1930_v14, %v1925_v7 }
 0x943   : > { %v1932_v17 = vadd.f32 -0.28449672, %v1931_v16 }
 0x945   : > { %v1933_v18 = vmul.f32 %v1932_v17, %v1925_v7 }
 0x947   : > { %v1934_v19 = vadd.f32 0.2548296, %v1933_v18 }
 0x949   : > { %v1935_v20 = vmul.f32 %v1934_v19, %v1925_v7 }
 0x94b   : > { %v1940_v22 = vmul.f32 %v2337_v21, %v1935_v20 }
 0x94d   : > { %v1941_v23 = vsub.f32 1.0, %v1940_v22 }
 0x94f   : > { %v1943_v24 = vsub.f32 0.0, %v1941_v23 }
 0x951   : > { %v1944_v25 = vsel %vm1942_vm4, %v1941_v23, %v1943_v24 }
 0x952   : > { %v1945_v27 = vadd.f32 1.0, %v1944_v25 }
 0x954   : > { %v1946_v54 = vmul.f32 %v1945_v27, %v1907_v26 }
 0x956   : > { %2227 = vmatmul.msk.f32.vlgmr.msrb.gmra.mxu1 %vm1956_vm5, %v1946_v54 }
 0x9d3   : > { %v1977_v29 = vpop.f32.mrf.mxu1 }
 0x9d4   : > { %v1978_v30 = vadd.f32 %v1977_v29, %v1955_v28 }
 0x9d6   : > { %v1980_v31 = vadd.f32 %v1978_v30, %v3057_v44 }
 0x9d8   : > { %v1981_v32 = vsel %vm418_vm0, %v1980_v31, 0.0 }
 0x9d9   : > { %1982 = vadd.xlane.f32.xlu2 %v1981_v32 }
 0xa4c   : > { %v1983_v33 = vpop.xlane.xlu2 %1982 }
 0xa4d   : > { %v1984_v34 = vmul.f32 %v1983_v33, %v2770_v1 }
 0xa4f   : > { %v1985_v35 = vsub.f32 %v1980_v31, %v1984_v34 }
 0xa51   : > { %v1986_v36 = vmul.f32 %v1985_v35, %v1985_v35 }
 0xa53   : > { %v1987_v37 = vsel %vm418_vm0, %v1986_v36, 0.0 }
 0xa54   : > { %1988 = vadd.xlane.f32.xlu0 %v1987_v37 }
 0xac7   : > { %v1989_v38 = vpop.xlane.xlu0 %1988 }
 0xac8   : > { %v1990_v49 = vmul.f32 %v1989_v38, %v2770_v1 }
 0xaca   : > { %v1991_v39 = vadd.f32 1e-05, %v1990_v49 }
 0xacc   : > { %2338 = vrsqrt.f32 %v1991_v39  ;;  %vm1998_vm7 = vweird.f32 %v1991_v39 }
 0xad2   : > { %v2339_v40 = vpop.eup %2338 }
 0xad3   : > { %v1993_v41 = vmul.f32 %v2339_v40, %v1991_v39  ;;  %vm1999_vm6 = vweird.f32 %v2339_v40 }
 0xad4   : > { %vm2000_vm8 = vmor %vm1998_vm7, %vm1999_vm6 }
 0xad5   : > { %v1994_v42 = vmul.f32 %v2339_v40, %v1993_v41 }
 0xad7   : > { %v1995_v43 = vmul.f32 0.5, %v1994_v42 }
 0xad9   : > { %v1996_v44 = vsub.f32 1.5, %v1995_v43 }
 0xadb   : > { %v1997_v46 = vmul.f32 %v2339_v40, %v1996_v44 }
 0xadd   : > { %v2001_v1 = vsel %vm2000_vm8, %v2339_v40, %v1997_v46 }
 0xade   : > { %v2002_v48 = vmul.f32 %v2001_v1, %v1985_v35 }
 0xae0   : > { %v2004_v51 = vmul.f32 %v2003_v47, %v2002_v48 }
 0xae2   : > { %v2006_v52 = vadd.f32 %v2005_v50, %v2004_v51 }
 0xae4   : > { %2007 = vst.msk [vmem:[%s309_s23] sm:$0xff] %vm418_vm0, %v2006_v52 }
 0xae5   : > { %2367 = shalt.err (!%p2364_p3)
}
 0xae6   : > { %2232 = dma.vmem_to_hbm [thread:$0]  (%p2488_p5), %s2022_s22, 128, %s2024_s24, %s2009_s9  }
 0xae7 PF: > { %p2238_p4 = scmp.ge.s32.totalorder %s2402_s30, 2  ;;  %s2035_s26 = sand.u32 1, %s2390_s27  }
 0xae8   : > { %s2036_s20 = scalar_lea.sflag [#allocation3], %s2035_s26 }
 0xae9   : > { %p2235_p7 = pnand %p2238_p4, %p2492_p6 }
 0xaeb   : > { %p2236_p8 = pneg %p2235_p7 }
 0xaed   : > { %2385 = dma.done.wait (%p2236_p8), %s2036_s20, 128  }
 0xaee   : > { %2387 = vsyncadd (%p2236_p8), %s2036_s20, 4294967168  ;;  %p18_p9 = scmp.ge.s32.totalorder %s2475_s11, 4   ;;  %s3139_s27 = smov %s2394_s28 }
 0xaef   : > { %s3140_s28 = smov %s2398_s29  ;;  %s3141_s29 = smov %s2486_s14 }
 0xaf0   : > { %s3142_s30 = smov %s2475_s11  ;;  %20 = sbr.rel (!%p18_p9) target bundleno = 3 (0x3), region = 95 }
 0xaf5   :  { %2042 = vsyncpa [#allocation3], 1 }
 0xaf6   :  { %2044 = vsyncpa [#allocation3 + $0x1], 1 }

</bundles_post_ra>
